<compile_context>
chip_gen: v7x
topology: tpu7x:2x2x1
jax: 0.10.0
libtpu: 0.0.40
codegen_flags: <defaults>
</compile_context>

<pallas_src>
import jax
import jax.numpy as jnp
from jax.experimental import pallas as pl
from jax.experimental.pallas import tpu as pltpu


# ----------------------------- Pallas kernel ------------------------------ #

def _encoder_kernel(p1_ref, w1_ref, b1_ref,
                    s2_ref, w2_ref, b2_ref,
                    s3_ref, w3_ref, b3_ref,
                    out_ref):
    """Fused conv1+ReLU -> conv2+ReLU -> conv3 for one batch element.

    p1_ref : (1, L1, K*C0) bf16   im2col patches for conv1 (channel-last)
    w1_ref : (K*C0, C1)    bf16
    s2_ref : (K, L2, L1)   bf16   0/1 selection matrices (stride-2, pad-1 gather)
    w2_ref : (K, C1, C2)   bf16
    s3_ref : (K, L3, L2)   bf16   0/1 selection matrices (stride-3, pad-2 gather)
    w3_ref : (K, C2, C3)   bf16
    b*_ref : (1, C*)       f32
    out_ref: (1, L3, C3)   f32    channel-last output slab
    """
    bf16 = jnp.bfloat16
    f32 = jnp.float32

    # ---- conv1 + ReLU: one small matmul (hidden under conv2/conv3's work) ----
    y1 = jnp.dot(p1_ref[0], w1_ref[...], preferred_element_type=f32)
    a1 = jnp.maximum(y1 + b1_ref[...], 0.0).astype(bf16)            # [L1, C1]

    # ---- conv2 + ReLU: 4 taps of (gather @ a1) @ W2[k], f32 accumulator ----
    K, L2, _ = s2_ref.shape
    C2 = w2_ref.shape[-1]
    acc2 = jnp.zeros((L2, C2), f32)
    for k in range(K):
        tap = jnp.dot(s2_ref[k], a1, preferred_element_type=f32)    # exact row gather
        acc2 = acc2 + jnp.dot(tap.astype(bf16), w2_ref[k],
                              preferred_element_type=f32)
    a2 = jnp.maximum(acc2 + b2_ref[...], 0.0).astype(bf16)          # [L2, C2]

    # ---- conv3 (no ReLU) ----
    _, L3, _ = s3_ref.shape
    C3 = w3_ref.shape[-1]
    acc3 = jnp.zeros((L3, C3), f32)
    for k in range(K):
        tap = jnp.dot(s3_ref[k], a2, preferred_element_type=f32)
        acc3 = acc3 + jnp.dot(tap.astype(bf16), w3_ref[k],
                              preferred_element_type=f32)

    out_ref[0] = acc3 + b3_ref[...]                                  # [L3, C3]


# ------------------------------ Wrapper ------------------------------------ #

def _conv_out_len(length, k, stride, padding):
    return (length + 2 * padding - k) // stride + 1


def _selection_matrices(l_in, l_out, k, stride, padding, dtype):
    """S[k, i, j] = 1 iff j == stride*i + k - padding (zero padding folded in)."""
    i = jnp.arange(l_out)[:, None]
    j = jnp.arange(l_in)[None, :]
    mats = [(j == (stride * i + kk - padding)).astype(dtype) for kk in range(k)]
    return jnp.stack(mats, axis=0)                 # [K, L_out, L_in]


@jax.jit
def encoder_forward(params, x):
    """x: [B, 4, L] float -> [B, 64, L_out]   (PyTorch NCL in / NCL out)."""
    f32, bf16 = jnp.float32, jnp.bfloat16
    w1, b1 = params["conv1"]
    w2, b2 = params["conv2"]
    w3, b3 = params["conv3"]

    B, C0, L = x.shape
    K = 4
    C1, C2, C3 = w1.shape[0], w2.shape[0], w3.shape[0]
    L1 = _conv_out_len(L, K, 2, 1)
    L2 = _conv_out_len(L1, K, 2, 1)
    L3 = _conv_out_len(L2, K, 3, 2)

    # conv1 im2col on the tiny raw 4-channel input (tap-major, channel-minor).
    x = x.astype(f32)
    xp = jnp.pad(x, ((0, 0), (0, 0), (1, 1)))                        # [B, C0, L+2]
    win = jnp.arange(L1)[:, None] * 2 + jnp.arange(K)[None, :]       # [L1, K]
    p1 = xp[:, :, win]                                               # [B, C0, L1, K]
    p1 = jnp.transpose(p1, (0, 2, 3, 1)).reshape(B, L1, K * C0).astype(bf16)

    # Weights: tap-major layouts, bf16 for the MXU; biases stay f32.
    w1m = jnp.transpose(w1, (2, 1, 0)).reshape(K * C0, C1).astype(bf16)  # [K*C0, C1]
    w2s = jnp.transpose(w2, (2, 1, 0)).astype(bf16)                      # [K, C1, C2]
    w3s = jnp.transpose(w3, (2, 1, 0)).astype(bf16)                      # [K, C2, C3]
    b1m = b1.reshape(1, C1).astype(f32)
    b2m = b2.reshape(1, C2).astype(f32)
    b3m = b3.reshape(1, C3).astype(f32)

    # 0/1 selection matrices: strided + zero-padded window gather via MXU.
    s2 = _selection_matrices(L1, L2, K, 2, 1, bf16)                  # [K, L2, L1]
    s3 = _selection_matrices(L2, L3, K, 3, 2, bf16)                  # [K, L3, L2]

    out = pl.pallas_call(
        _encoder_kernel,
        out_shape=jax.ShapeDtypeStruct((B, L3, C3), f32),
        grid=(B,),
        in_specs=[
            pl.BlockSpec((1, L1, K * C0), lambda b: (b, 0, 0)),
            pl.BlockSpec((K * C0, C1),    lambda b: (0, 0)),
            pl.BlockSpec((1, C1),         lambda b: (0, 0)),
            pl.BlockSpec((K, L2, L1),     lambda b: (0, 0, 0)),
            pl.BlockSpec((K, C1, C2),     lambda b: (0, 0, 0)),
            pl.BlockSpec((1, C2),         lambda b: (0, 0)),
            pl.BlockSpec((K, L3, L2),     lambda b: (0, 0, 0)),
            pl.BlockSpec((K, C2, C3),     lambda b: (0, 0, 0)),
            pl.BlockSpec((1, C3),         lambda b: (0, 0)),
        ],
        out_specs=pl.BlockSpec((1, L3, C3), lambda b: (b, 0, 0)),
        compiler_params=pltpu.CompilerParams(
            dimension_semantics=("parallel",)),
    )(p1, w1m, b1m, s2, w2s, b2m, s3, w3s, b3m)

    # Single layout fix-up at the very end: channel-last -> PyTorch NCL.
    return jnp.transpose(out, (0, 2, 1))                             # [B, C3, L3]


# ------------------------- Params / reference ------------------------------ #

def _init_conv_params(key, c_out, c_in, k):
    """PyTorch Conv1d default init: U[-1/sqrt(fan_in), 1/sqrt(fan_in)]."""
    kw, kb = jax.random.split(key)
    bound = 1.0 / jnp.sqrt(float(c_in * k))
    w = jax.random.uniform(kw, (c_out, c_in, k), jnp.float32, -bound, bound)
    b = jax.random.uniform(kb, (c_out,), jnp.float32, -bound, bound)
    return w, b


def make_encoder_params(key):
    k1, k2, k3 = jax.random.split(key, 3)
    return {
        "conv1": _init_conv_params(k1, 256, 4, 4),
        "conv2": _init_conv_params(k2, 512, 256, 4),
        "conv3": _init_conv_params(k3, 64, 512, 4),
    }


def _encoder_reference(params, x):
    x = x.astype(jnp.float32)

    def conv(x, w, b, stride, padding):
        y = jax.lax.conv_general_dilated(
            x, w, window_strides=(stride,), padding=[(padding, padding)],
            dimension_numbers=("NCH", "OIH", "NCH"))
        return y + b[None, :, None]

    w1, b1 = params["conv1"]
    w2, b2 = params["conv2"]
    w3, b3 = params["conv3"]
    x = jax.nn.relu(conv(x, w1, b1, 2, 1))
    x = jax.nn.relu(conv(x, w2, b2, 2, 1))
    return conv(x, w3, b3, 3, 2)


if __name__ == "__main__":
    key = jax.random.PRNGKey(0)
    pkey, xkey = jax.random.split(key)

    params = make_encoder_params(pkey)

    # Small input consistent with the module: batch=2, channels=4, length=48.
    x = jax.random.normal(xkey, (2, 4, 48), jnp.float32)

    out = jax.block_until_ready(encoder_forward(params, x))
    ref = jax.block_until_ready(_encoder_reference(params, x))

    assert out.shape == ref.shape == (2, 64, 5), out.shape
    # bf16 MXU operands -> looser tolerance than the pure-f32 variant.
    assert jnp.allclose(out, ref, atol=2e-2, rtol=2e-2), (
        "max abs err = %f" % float(jnp.max(jnp.abs(out - ref))))

    print("KERNEL_OK")
</pallas_src>

<mosaic_0001>
module attributes {stable_mosaic.version = 11 : i64} {
  func.func @_encoder_kernel(%arg0: i32, %arg1: memref<1x24x16xbf16, #tpu.memory_space<vmem>>, %arg2: memref<16x256xbf16, #tpu.memory_space<vmem>>, %arg3: memref<1x256xf32, #tpu.memory_space<vmem>>, %arg4: memref<4x12x24xbf16, #tpu.memory_space<vmem>>, %arg5: memref<4x256x512xbf16, #tpu.memory_space<vmem>>, %arg6: memref<1x512xf32, #tpu.memory_space<vmem>>, %arg7: memref<4x5x12xbf16, #tpu.memory_space<vmem>>, %arg8: memref<4x512x64xbf16, #tpu.memory_space<vmem>>, %arg9: memref<1x64xf32, #tpu.memory_space<vmem>>, %arg10: memref<1x5x64xf32, #tpu.memory_space<vmem>>) attributes {dimension_semantics = [#tpu.dimension_semantics<parallel>], iteration_bounds = array<i64: 2>, scalar_prefetch = 0 : i64, scratch_operands = 0 : i64, tpu.core_type = #tpu.core_type<tc>, window_params = [{transform_indices = @transform_0, window_bounds = array<i64: 1, 24, 16>}, {pipeline_mode = #tpu.pipeline_mode<synchronous>, transform_indices = @transform_1, window_bounds = array<i64: 16, 256>}, {pipeline_mode = #tpu.pipeline_mode<synchronous>, transform_indices = @transform_2, window_bounds = array<i64: 1, 256>}, {pipeline_mode = #tpu.pipeline_mode<synchronous>, transform_indices = @transform_3, window_bounds = array<i64: 4, 12, 24>}, {pipeline_mode = #tpu.pipeline_mode<synchronous>, transform_indices = @transform_4, window_bounds = array<i64: 4, 256, 512>}, {pipeline_mode = #tpu.pipeline_mode<synchronous>, transform_indices = @transform_5, window_bounds = array<i64: 1, 512>}, {pipeline_mode = #tpu.pipeline_mode<synchronous>, transform_indices = @transform_6, window_bounds = array<i64: 4, 5, 12>}, {pipeline_mode = #tpu.pipeline_mode<synchronous>, transform_indices = @transform_7, window_bounds = array<i64: 4, 512, 64>}, {pipeline_mode = #tpu.pipeline_mode<synchronous>, transform_indices = @transform_8, window_bounds = array<i64: 1, 64>}, {transform_indices = @transform_9, window_bounds = array<i64: 1, 5, 64>}]} {
    %c0 = arith.constant 0 : index
    %c0_0 = arith.constant 0 : index
    %c0_1 = arith.constant 0 : index
    %0 = vector.load %arg1[%c0, %c0_0, %c0_1] : memref<1x24x16xbf16, #tpu.memory_space<vmem>>, vector<1x24x16xbf16>
    %1 = vector.shape_cast %0 : vector<1x24x16xbf16> to vector<24x16xbf16>
    %c0_2 = arith.constant 0 : index
    %c0_3 = arith.constant 0 : index
    %2 = vector.load %arg2[%c0_2, %c0_3] : memref<16x256xbf16, #tpu.memory_space<vmem>>, vector<16x256xbf16>
    %cst = arith.constant dense<0.000000e+00> : vector<24x256xf32>
    %3 = tpu.matmul %1, %2, %cst {dimension_numbers = #tpu.dot_dimension_numbers<[1], [0], [0], [1], [0, 0, 1, 1], [], []>} : vector<24x16xbf16>, vector<16x256xbf16>, vector<24x256xf32> -> vector<24x256xf32>
    %c0_4 = arith.constant 0 : index
    %c0_5 = arith.constant 0 : index
    %4 = vector.load %arg3[%c0_4, %c0_5] : memref<1x256xf32, #tpu.memory_space<vmem>>, vector<1x256xf32>
    %5 = vector.broadcast %4 : vector<1x256xf32> to vector<24x256xf32>
    %6 = arith.addf %3, %5 : vector<24x256xf32>
    %cst_6 = arith.constant 0.000000e+00 : f32
    %7 = vector.broadcast %cst_6 : f32 to vector<24x256xf32>
    %8 = arith.maximumf %6, %7 : vector<24x256xf32>
    %9 = arith.truncf %8 : vector<24x256xf32> to vector<24x256xbf16>
    %cst_7 = arith.constant 0.000000e+00 : f32
    %10 = vector.broadcast %cst_7 : f32 to vector<12x512xf32>
    %c0_8 = arith.constant 0 : index
    %c0_9 = arith.constant 0 : index
    %c0_10 = arith.constant 0 : index
    %11 = vector.load %arg4[%c0_8, %c0_9, %c0_10] : memref<4x12x24xbf16, #tpu.memory_space<vmem>>, vector<1x12x24xbf16>
    %12 = vector.shape_cast %11 : vector<1x12x24xbf16> to vector<12x24xbf16>
    %cst_11 = arith.constant dense<0.000000e+00> : vector<12x256xf32>
    %13 = tpu.matmul %12, %9, %cst_11 {dimension_numbers = #tpu.dot_dimension_numbers<[1], [0], [0], [1], [0, 0, 1, 1], [], []>} : vector<12x24xbf16>, vector<24x256xbf16>, vector<12x256xf32> -> vector<12x256xf32>
    %14 = arith.truncf %13 : vector<12x256xf32> to vector<12x256xbf16>
    %c0_12 = arith.constant 0 : index
    %c0_13 = arith.constant 0 : index
    %c0_14 = arith.constant 0 : index
    %15 = vector.load %arg5[%c0_12, %c0_13, %c0_14] : memref<4x256x512xbf16, #tpu.memory_space<vmem>>, vector<1x256x512xbf16>
    %16 = vector.shape_cast %15 : vector<1x256x512xbf16> to vector<256x512xbf16>
    %cst_15 = arith.constant dense<0.000000e+00> : vector<12x512xf32>
    %17 = tpu.matmul %14, %16, %cst_15 {dimension_numbers = #tpu.dot_dimension_numbers<[1], [0], [0], [1], [0, 0, 1, 1], [], []>} : vector<12x256xbf16>, vector<256x512xbf16>, vector<12x512xf32> -> vector<12x512xf32>
    %18 = arith.addf %10, %17 : vector<12x512xf32>
    %c1 = arith.constant 1 : index
    %c0_16 = arith.constant 0 : index
    %c0_17 = arith.constant 0 : index
    %19 = vector.load %arg4[%c1, %c0_16, %c0_17] : memref<4x12x24xbf16, #tpu.memory_space<vmem>>, vector<1x12x24xbf16>
    %20 = vector.shape_cast %19 : vector<1x12x24xbf16> to vector<12x24xbf16>
    %cst_18 = arith.constant dense<0.000000e+00> : vector<12x256xf32>
    %21 = tpu.matmul %20, %9, %cst_18 {dimension_numbers = #tpu.dot_dimension_numbers<[1], [0], [0], [1], [0, 0, 1, 1], [], []>} : vector<12x24xbf16>, vector<24x256xbf16>, vector<12x256xf32> -> vector<12x256xf32>
    %22 = arith.truncf %21 : vector<12x256xf32> to vector<12x256xbf16>
    %c1_19 = arith.constant 1 : index
    %c0_20 = arith.constant 0 : index
    %c0_21 = arith.constant 0 : index
    %23 = vector.load %arg5[%c1_19, %c0_20, %c0_21] : memref<4x256x512xbf16, #tpu.memory_space<vmem>>, vector<1x256x512xbf16>
    %24 = vector.shape_cast %23 : vector<1x256x512xbf16> to vector<256x512xbf16>
    %cst_22 = arith.constant dense<0.000000e+00> : vector<12x512xf32>
    %25 = tpu.matmul %22, %24, %cst_22 {dimension_numbers = #tpu.dot_dimension_numbers<[1], [0], [0], [1], [0, 0, 1, 1], [], []>} : vector<12x256xbf16>, vector<256x512xbf16>, vector<12x512xf32> -> vector<12x512xf32>
    %26 = arith.addf %18, %25 : vector<12x512xf32>
    %c2 = arith.constant 2 : index
    %c0_23 = arith.constant 0 : index
    %c0_24 = arith.constant 0 : index
    %27 = vector.load %arg4[%c2, %c0_23, %c0_24] : memref<4x12x24xbf16, #tpu.memory_space<vmem>>, vector<1x12x24xbf16>
    %28 = vector.shape_cast %27 : vector<1x12x24xbf16> to vector<12x24xbf16>
    %cst_25 = arith.constant dense<0.000000e+00> : vector<12x256xf32>
    %29 = tpu.matmul %28, %9, %cst_25 {dimension_numbers = #tpu.dot_dimension_numbers<[1], [0], [0], [1], [0, 0, 1, 1], [], []>} : vector<12x24xbf16>, vector<24x256xbf16>, vector<12x256xf32> -> vector<12x256xf32>
    %30 = arith.truncf %29 : vector<12x256xf32> to vector<12x256xbf16>
    %c2_26 = arith.constant 2 : index
    %c0_27 = arith.constant 0 : index
    %c0_28 = arith.constant 0 : index
    %31 = vector.load %arg5[%c2_26, %c0_27, %c0_28] : memref<4x256x512xbf16, #tpu.memory_space<vmem>>, vector<1x256x512xbf16>
    %32 = vector.shape_cast %31 : vector<1x256x512xbf16> to vector<256x512xbf16>
    %cst_29 = arith.constant dense<0.000000e+00> : vector<12x512xf32>
    %33 = tpu.matmul %30, %32, %cst_29 {dimension_numbers = #tpu.dot_dimension_numbers<[1], [0], [0], [1], [0, 0, 1, 1], [], []>} : vector<12x256xbf16>, vector<256x512xbf16>, vector<12x512xf32> -> vector<12x512xf32>
    %34 = arith.addf %26, %33 : vector<12x512xf32>
    %c3 = arith.constant 3 : index
    %c0_30 = arith.constant 0 : index
    %c0_31 = arith.constant 0 : index
    %35 = vector.load %arg4[%c3, %c0_30, %c0_31] : memref<4x12x24xbf16, #tpu.memory_space<vmem>>, vector<1x12x24xbf16>
    %36 = vector.shape_cast %35 : vector<1x12x24xbf16> to vector<12x24xbf16>
    %cst_32 = arith.constant dense<0.000000e+00> : vector<12x256xf32>
    %37 = tpu.matmul %36, %9, %cst_32 {dimension_numbers = #tpu.dot_dimension_numbers<[1], [0], [0], [1], [0, 0, 1, 1], [], []>} : vector<12x24xbf16>, vector<24x256xbf16>, vector<12x256xf32> -> vector<12x256xf32>
    %38 = arith.truncf %37 : vector<12x256xf32> to vector<12x256xbf16>
    %c3_33 = arith.constant 3 : index
    %c0_34 = arith.constant 0 : index
    %c0_35 = arith.constant 0 : index
    %39 = vector.load %arg5[%c3_33, %c0_34, %c0_35] : memref<4x256x512xbf16, #tpu.memory_space<vmem>>, vector<1x256x512xbf16>
    %40 = vector.shape_cast %39 : vector<1x256x512xbf16> to vector<256x512xbf16>
    %cst_36 = arith.constant dense<0.000000e+00> : vector<12x512xf32>
    %41 = tpu.matmul %38, %40, %cst_36 {dimension_numbers = #tpu.dot_dimension_numbers<[1], [0], [0], [1], [0, 0, 1, 1], [], []>} : vector<12x256xbf16>, vector<256x512xbf16>, vector<12x512xf32> -> vector<12x512xf32>
    %42 = arith.addf %34, %41 : vector<12x512xf32>
    %c0_37 = arith.constant 0 : index
    %c0_38 = arith.constant 0 : index
    %43 = vector.load %arg6[%c0_37, %c0_38] : memref<1x512xf32, #tpu.memory_space<vmem>>, vector<1x512xf32>
    %44 = vector.broadcast %43 : vector<1x512xf32> to vector<12x512xf32>
    %45 = arith.addf %42, %44 : vector<12x512xf32>
    %cst_39 = arith.constant 0.000000e+00 : f32
    %46 = vector.broadcast %cst_39 : f32 to vector<12x512xf32>
    %47 = arith.maximumf %45, %46 : vector<12x512xf32>
    %48 = arith.truncf %47 : vector<12x512xf32> to vector<12x512xbf16>
    %cst_40 = arith.constant 0.000000e+00 : f32
    %49 = vector.broadcast %cst_40 : f32 to vector<5x64xf32>
    %c0_41 = arith.constant 0 : index
    %c0_42 = arith.constant 0 : index
    %c0_43 = arith.constant 0 : index
    %50 = vector.load %arg7[%c0_41, %c0_42, %c0_43] : memref<4x5x12xbf16, #tpu.memory_space<vmem>>, vector<1x5x12xbf16>
    %51 = vector.shape_cast %50 : vector<1x5x12xbf16> to vector<5x12xbf16>
    %cst_44 = arith.constant dense<0.000000e+00> : vector<5x512xf32>
    %52 = tpu.matmul %51, %48, %cst_44 {dimension_numbers = #tpu.dot_dimension_numbers<[1], [0], [0], [1], [0, 0, 1, 1], [], []>} : vector<5x12xbf16>, vector<12x512xbf16>, vector<5x512xf32> -> vector<5x512xf32>
    %53 = arith.truncf %52 : vector<5x512xf32> to vector<5x512xbf16>
    %c0_45 = arith.constant 0 : index
    %c0_46 = arith.constant 0 : index
    %c0_47 = arith.constant 0 : index
    %54 = vector.load %arg8[%c0_45, %c0_46, %c0_47] : memref<4x512x64xbf16, #tpu.memory_space<vmem>>, vector<1x512x64xbf16>
    %55 = vector.shape_cast %54 : vector<1x512x64xbf16> to vector<512x64xbf16>
    %cst_48 = arith.constant dense<0.000000e+00> : vector<5x64xf32>
    %56 = tpu.matmul %53, %55, %cst_48 {dimension_numbers = #tpu.dot_dimension_numbers<[1], [0], [0], [1], [0, 0, 1, 1], [], []>} : vector<5x512xbf16>, vector<512x64xbf16>, vector<5x64xf32> -> vector<5x64xf32>
    %57 = arith.addf %49, %56 : vector<5x64xf32>
    %c1_49 = arith.constant 1 : index
    %c0_50 = arith.constant 0 : index
    %c0_51 = arith.constant 0 : index
    %58 = vector.load %arg7[%c1_49, %c0_50, %c0_51] : memref<4x5x12xbf16, #tpu.memory_space<vmem>>, vector<1x5x12xbf16>
    %59 = vector.shape_cast %58 : vector<1x5x12xbf16> to vector<5x12xbf16>
    %cst_52 = arith.constant dense<0.000000e+00> : vector<5x512xf32>
    %60 = tpu.matmul %59, %48, %cst_52 {dimension_numbers = #tpu.dot_dimension_numbers<[1], [0], [0], [1], [0, 0, 1, 1], [], []>} : vector<5x12xbf16>, vector<12x512xbf16>, vector<5x512xf32> -> vector<5x512xf32>
    %61 = arith.truncf %60 : vector<5x512xf32> to vector<5x512xbf16>
    %c1_53 = arith.constant 1 : index
    %c0_54 = arith.constant 0 : index
    %c0_55 = arith.constant 0 : index
    %62 = vector.load %arg8[%c1_53, %c0_54, %c0_55] : memref<4x512x64xbf16, #tpu.memory_space<vmem>>, vector<1x512x64xbf16>
    %63 = vector.shape_cast %62 : vector<1x512x64xbf16> to vector<512x64xbf16>
    %cst_56 = arith.constant dense<0.000000e+00> : vector<5x64xf32>
    %64 = tpu.matmul %61, %63, %cst_56 {dimension_numbers = #tpu.dot_dimension_numbers<[1], [0], [0], [1], [0, 0, 1, 1], [], []>} : vector<5x512xbf16>, vector<512x64xbf16>, vector<5x64xf32> -> vector<5x64xf32>
    %65 = arith.addf %57, %64 : vector<5x64xf32>
    %c2_57 = arith.constant 2 : index
    %c0_58 = arith.constant 0 : index
    %c0_59 = arith.constant 0 : index
    %66 = vector.load %arg7[%c2_57, %c0_58, %c0_59] : memref<4x5x12xbf16, #tpu.memory_space<vmem>>, vector<1x5x12xbf16>
    %67 = vector.shape_cast %66 : vector<1x5x12xbf16> to vector<5x12xbf16>
    %cst_60 = arith.constant dense<0.000000e+00> : vector<5x512xf32>
    %68 = tpu.matmul %67, %48, %cst_60 {dimension_numbers = #tpu.dot_dimension_numbers<[1], [0], [0], [1], [0, 0, 1, 1], [], []>} : vector<5x12xbf16>, vector<12x512xbf16>, vector<5x512xf32> -> vector<5x512xf32>
    %69 = arith.truncf %68 : vector<5x512xf32> to vector<5x512xbf16>
    %c2_61 = arith.constant 2 : index
    %c0_62 = arith.constant 0 : index
    %c0_63 = arith.constant 0 : index
    %70 = vector.load %arg8[%c2_61, %c0_62, %c0_63] : memref<4x512x64xbf16, #tpu.memory_space<vmem>>, vector<1x512x64xbf16>
    %71 = vector.shape_cast %70 : vector<1x512x64xbf16> to vector<512x64xbf16>
    %cst_64 = arith.constant dense<0.000000e+00> : vector<5x64xf32>
    %72 = tpu.matmul %69, %71, %cst_64 {dimension_numbers = #tpu.dot_dimension_numbers<[1], [0], [0], [1], [0, 0, 1, 1], [], []>} : vector<5x512xbf16>, vector<512x64xbf16>, vector<5x64xf32> -> vector<5x64xf32>
    %73 = arith.addf %65, %72 : vector<5x64xf32>
    %c3_65 = arith.constant 3 : index
    %c0_66 = arith.constant 0 : index
    %c0_67 = arith.constant 0 : index
    %74 = vector.load %arg7[%c3_65, %c0_66, %c0_67] : memref<4x5x12xbf16, #tpu.memory_space<vmem>>, vector<1x5x12xbf16>
    %75 = vector.shape_cast %74 : vector<1x5x12xbf16> to vector<5x12xbf16>
    %cst_68 = arith.constant dense<0.000000e+00> : vector<5x512xf32>
    %76 = tpu.matmul %75, %48, %cst_68 {dimension_numbers = #tpu.dot_dimension_numbers<[1], [0], [0], [1], [0, 0, 1, 1], [], []>} : vector<5x12xbf16>, vector<12x512xbf16>, vector<5x512xf32> -> vector<5x512xf32>
    %77 = arith.truncf %76 : vector<5x512xf32> to vector<5x512xbf16>
    %c3_69 = arith.constant 3 : index
    %c0_70 = arith.constant 0 : index
    %c0_71 = arith.constant 0 : index
    %78 = vector.load %arg8[%c3_69, %c0_70, %c0_71] : memref<4x512x64xbf16, #tpu.memory_space<vmem>>, vector<1x512x64xbf16>
    %79 = vector.shape_cast %78 : vector<1x512x64xbf16> to vector<512x64xbf16>
    %cst_72 = arith.constant dense<0.000000e+00> : vector<5x64xf32>
    %80 = tpu.matmul %77, %79, %cst_72 {dimension_numbers = #tpu.dot_dimension_numbers<[1], [0], [0], [1], [0, 0, 1, 1], [], []>} : vector<5x512xbf16>, vector<512x64xbf16>, vector<5x64xf32> -> vector<5x64xf32>
    %81 = arith.addf %73, %80 : vector<5x64xf32>
    %c0_73 = arith.constant 0 : index
    %c0_74 = arith.constant 0 : index
    %82 = vector.load %arg9[%c0_73, %c0_74] : memref<1x64xf32, #tpu.memory_space<vmem>>, vector<1x64xf32>
    %83 = vector.broadcast %82 : vector<1x64xf32> to vector<5x64xf32>
    %84 = arith.addf %81, %83 : vector<5x64xf32>
    %c0_75 = arith.constant 0 : index
    %c0_76 = arith.constant 0 : index
    %c0_77 = arith.constant 0 : index
    %85 = vector.load %arg10[%c0_75, %c0_76, %c0_77] : memref<1x5x64xf32, #tpu.memory_space<vmem>>, vector<1x5x64xf32>
    %86 = vector.shape_cast %85 : vector<1x5x64xf32> to vector<5x64xf32>
    %87 = vector.shape_cast %84 : vector<5x64xf32> to vector<1x5x64xf32>
    tpu.vector_store %arg10[%c0_75, %c0_76, %c0_77], %87 {strides = array<i32>} : memref<1x5x64xf32, #tpu.memory_space<vmem>>, vector<1x5x64xf32>,
    return
  }
  func.func @transform_0(%arg0: i32) -> (i32, i32, i32) {
    %c0_i32 = arith.constant 0 : i32
    %c0_i32_0 = arith.constant 0 : i32
    %c0_i32_1 = arith.constant 0 : i32
    return %arg0, %c0_i32, %c0_i32_0 : i32, i32, i32
  }
  func.func @transform_1(%arg0: i32) -> (i32, i32) {
    %c0_i32 = arith.constant 0 : i32
    %c0_i32_0 = arith.constant 0 : i32
    %c0_i32_1 = arith.constant 0 : i32
    return %c0_i32, %c0_i32_0 : i32, i32
  }
  func.func @transform_2(%arg0: i32) -> (i32, i32) {
    %c0_i32 = arith.constant 0 : i32
    %c0_i32_0 = arith.constant 0 : i32
    %c0_i32_1 = arith.constant 0 : i32
    return %c0_i32, %c0_i32_0 : i32, i32
  }
  func.func @transform_3(%arg0: i32) -> (i32, i32, i32) {
    %c0_i32 = arith.constant 0 : i32
    %c0_i32_0 = arith.constant 0 : i32
    %c0_i32_1 = arith.constant 0 : i32
    %c0_i32_2 = arith.constant 0 : i32
    return %c0_i32, %c0_i32_0, %c0_i32_1 : i32, i32, i32
  }
  func.func @transform_4(%arg0: i32) -> (i32, i32, i32) {
    %c0_i32 = arith.constant 0 : i32
    %c0_i32_0 = arith.constant 0 : i32
    %c0_i32_1 = arith.constant 0 : i32
    %c0_i32_2 = arith.constant 0 : i32
    return %c0_i32, %c0_i32_0, %c0_i32_1 : i32, i32, i32
  }
  func.func @transform_5(%arg0: i32) -> (i32, i32) {
    %c0_i32 = arith.constant 0 : i32
    %c0_i32_0 = arith.constant 0 : i32
    %c0_i32_1 = arith.constant 0 : i32
    return %c0_i32, %c0_i32_0 : i32, i32
  }
  func.func @transform_6(%arg0: i32) -> (i32, i32, i32) {
    %c0_i32 = arith.constant 0 : i32
    %c0_i32_0 = arith.constant 0 : i32
    %c0_i32_1 = arith.constant 0 : i32
    %c0_i32_2 = arith.constant 0 : i32
    return %c0_i32, %c0_i32_0, %c0_i32_1 : i32, i32, i32
  }
  func.func @transform_7(%arg0: i32) -> (i32, i32, i32) {
    %c0_i32 = arith.constant 0 : i32
    %c0_i32_0 = arith.constant 0 : i32
    %c0_i32_1 = arith.constant 0 : i32
    %c0_i32_2 = arith.constant 0 : i32
    return %c0_i32, %c0_i32_0, %c0_i32_1 : i32, i32, i32
  }
  func.func @transform_8(%arg0: i32) -> (i32, i32) {
    %c0_i32 = arith.constant 0 : i32
    %c0_i32_0 = arith.constant 0 : i32
    %c0_i32_1 = arith.constant 0 : i32
    return %c0_i32, %c0_i32_0 : i32, i32
  }
  func.func @transform_9(%arg0: i32) -> (i32, i32, i32) {
    %c0_i32 = arith.constant 0 : i32
    %c0_i32_0 = arith.constant 0 : i32
    %c0_i32_1 = arith.constant 0 : i32
    return %arg0, %c0_i32, %c0_i32_0 : i32, i32, i32
  }
}

</mosaic_0001>

<bundles_post_ra>
// kernel: encoder_forward.1
= control target key start
LH: loop header
LB: loop body
LE: loop exit
PB: predicated region body
PF: predicated region fallthrough
CT: control target
= control target key end

     0   :  { %s6007_s30 = smov 0   ;;  %s7337_s0 = inlined_call_operand.vmem [shape: bf16[2,24,16], index: 0, kind: input, shape index: {}]   ;;  %s7338_s1 = inlined_call_operand.vmem [shape: bf16[16,256], index: 1, kind: input, shape index: {}]   ;;  %s7339_s2 = inlined_call_operand.vmem [shape: f32[1,256], index: 2, kind: input, shape index: {}]   ;;  %s7340_s3 = inlined_call_operand.vmem [shape: bf16[4,12,24], index: 3, kind: input, shape index: {}]   ;;  %s7341_s4 = inlined_call_operand.vmem [shape: bf16[4,256,512], index: 4, kind: input, shape index: {}]   ;;  %s7342_s5 = inlined_call_operand.vmem [shape: f32[1,512], index: 5, kind: input, shape index: {}]   ;;  %s7343_s6 = inlined_call_operand.vmem [shape: bf16[4,5,12], index: 6, kind: input, shape index: {}]   ;;  %s7344_s7 = inlined_call_operand.vmem [shape: bf16[4,512,64], index: 7, kind: input, shape index: {}]   ;;  %s7345_s8 = inlined_call_operand.vmem [shape: f32[1,64], index: 8, kind: input, shape index: {}]   ;;  %s7346_s9 = inlined_call_operand.vmem [shape: f32[2,5,64], index: 9, kind: output, shape index: {}]  }
   0x1 LB: > { %s4396_s10 = sadd.s32 4294967295, %s5954_s30   ;;  %p4400_p0 = scmp.ge.s32.totalorder %s5954_s30, 1  ;;  %s5954_s30 = sphi %s6007_s30, %s19_s30  }
   0x2   : > { %p287_p1 = scmp.lt.s32.totalorder %s5954_s30, 3 }
   0x4   : > { %p288_p2 = pnand %p4400_p0, %p287_p1 }
   0x5   : > { %v5427_v0 = vld [vmem:[%s7338_s1 + $0x4] ss:$8 sps:$4 sm:$0xff] (!%p288_p2)   ;;  %p322_p3 = scmp.lt.s32.totalorder (!%p288_p2), %s4396_s10, 1  ;;  %v5429_v1 = vld [vmem:[%s7338_s1] ss:$8 sps:$4 sm:$0xff] (!%p288_p2)   ;;  %v5956_v2 = vmov (!%p288_p2), 0   ;;  %v339_v31 = vlaneseq (!%p288_p2) }
   0x6   : > { %291 = sbr.rel (%p288_p2) target bundleno = 2142 (0x85e), region = 56  ;;  %406 = vmatprep.mubr.bf16.mxu0 (!%p288_p2), %v5956_v2  ;;  %485 = vmatprep.mubr.bf16.mxu1 (!%p288_p2), %v5956_v2  ;;  %vm367_vm0 = vcmask (!%p288_p2), 130048   ;;  %v5434_v5 = vld [vmem:[%s7341_s4 + $0x200] ss:$16 sps:$4 sm:$0xff] (!%p288_p2)   ;;  %v5436_v6 = vld [vmem:[%s7341_s4 + $0x204] ss:$16 sps:$4 sm:$0xff] (!%p288_p2)  }
   0x7   : > { %374 = vmatprep.subr.bf16.mxu0 (!%p288_p2), %v5427_v0  ;;  %v5442_v7 = vld [vmem:[%s7341_s4 + $0x224] ss:$16 sps:$4 sm:$0xff] (!%p288_p2)   ;;  %v5440_v8 = vld [vmem:[%s7341_s4 + $0x220] ss:$16 sps:$4 sm:$0xff] (!%p288_p2)   ;;  %v6108_v32 = vshrl.u32 (!%p288_p2), %v339_v31, 7  ;;  %vm446_vm1 = vcmask (!%p288_p2), 1043456  }
   0x8   : > { %375 = vmatpush1.bf16.msra.mxu0 (!%p288_p2), %v5429_v1  ;;  %v5448_v9 = vld [vmem:[%s7341_s4 + $0x244] ss:$16 sps:$4 sm:$0xff] (!%p288_p2)   ;;  %v5446_v10 = vld [vmem:[%s7341_s4 + $0x240] ss:$16 sps:$4 sm:$0xff] (!%p288_p2)   ;;  %vm442_vm2 = vcmask (!%p288_p2), 195584   ;;  %vm2612_vm3 = vcmask (!%p288_p2), 1045504  }
   0x9   : > { %1003 = vmatprep.subr.bf16.mxu0 (!%p288_p2), %v5436_v6  ;;  %v5454_v11 = vld [vmem:[%s7341_s4 + $0x264] ss:$16 sps:$4 sm:$0xff] (!%p288_p2)   ;;  %v5452_v12 = vld [vmem:[%s7341_s4 + $0x260] ss:$16 sps:$4 sm:$0xff] (!%p288_p2)   ;;  %v341_v33 = vsub.s32 (!%p288_p2), 0, %v6108_v32  ;;  %v345_v35 = vsub.s32 (!%p288_p2), 1, %v6108_v32 }
   0xa   : > { %v5460_v13 = vld [vmem:[%s7341_s4 + $0x284] ss:$16 sps:$4 sm:$0xff] (!%p288_p2)   ;;  %v5458_v14 = vld [vmem:[%s7341_s4 + $0x280] ss:$16 sps:$4 sm:$0xff] (!%p288_p2)   ;;  %v5439_v0 = vld [vmem:[%s7341_s4 + $0x20c] ss:$16 sps:$4 sm:$0xff] (!%p288_p2)  }
   0xb   : > { %v5466_v15 = vld [vmem:[%s7341_s4 + $0x2a4] ss:$16 sps:$4 sm:$0xff] (!%p288_p2)   ;;  %v5464_v16 = vld [vmem:[%s7341_s4 + $0x2a0] ss:$16 sps:$4 sm:$0xff] (!%p288_p2)   ;;  %v5433_v1 = vld [vmem:[%s7340_s3 + $0x8] sm:$0x3f] (!%p288_p2)  }
   0xc   : > { %v5472_v17 = vld [vmem:[%s7341_s4 + $0x2c4] ss:$16 sps:$4 sm:$0xff] (!%p288_p2)   ;;  %v5470_v18 = vld [vmem:[%s7341_s4 + $0x2c0] ss:$16 sps:$4 sm:$0xff] (!%p288_p2)   ;;  %v5451_v6 = vld [vmem:[%s7341_s4 + $0x24c] ss:$16 sps:$4 sm:$0xff] (!%p288_p2)  }
   0xd   : > { %s7348_s10 = smov (!%p322_p3, %s4396_s10), 1  ;;  %v5478_v19 = vld [vmem:[%s7341_s4 + $0x2e4] ss:$16 sps:$4 sm:$0xff]   ;;  %v5476_v20 = vld [vmem:[%s7341_s4 + $0x2e0] ss:$16 sps:$4 sm:$0xff]   ;;  %vm2608_vm4 = vcmask 97280  }
   0xe   : > { %s5417_s15 = smul.u32 12, %s7348_s10  ;;  %v5484_v21 = vld [vmem:[%s7341_s4 + $0x304] ss:$16 sps:$4 sm:$0xff]   ;;  %v5482_v22 = vld [vmem:[%s7341_s4 + $0x300] ss:$16 sps:$4 sm:$0xff]   ;;  %s4402_s28 = sshll.u32 %s7348_s10, 3 }
   0xf   : > { %v5490_v23 = vld [vmem:[%s7341_s4 + $0x324] ss:$16 sps:$4 sm:$0xff]   ;;  %v5488_v24 = vld [vmem:[%s7341_s4 + $0x320] ss:$16 sps:$4 sm:$0xff]   ;;  %v5515_v31 = vld [vmem:[%s7341_s4 + $0x3a8] ss:$16 sps:$4 sm:$0xff]   ;;  %s330_s14 = scalar_lea.vmem %s7346_s9, %s4402_s28 }
  0x10   : > { %s326_s18 = scalar_lea.vmem %s7337_s0, %s5417_s15  ;;  %v5496_v25 = vld [vmem:[%s7341_s4 + $0x344] ss:$16 sps:$4 sm:$0xff]   ;;  %v5494_v26 = vld [vmem:[%s7341_s4 + $0x340] ss:$16 sps:$4 sm:$0xff]   ;;  %vm4341_vm5 = vcmask 520192  }
  0x11   : > { %v5430_v3 = vld [vmem:[%s326_s18] sm:$0xff]   ;;  %v5431_v4 = vld [vmem:[%s326_s18 + $0x8] ss:$0 sps:$4 sm:$0xff]  }
  0x12   : > { %4407 = vmatmul.mubr.msk.bf16.vlgmr.msra.gmra.mrb[0].mxu0 %vm367_vm0, %v5430_v3  ;;  %v5502_v27 = vld [vmem:[%s7341_s4 + $0x364] ss:$16 sps:$4 sm:$0xff]   ;;  %v5500_v28 = vld [vmem:[%s7341_s4 + $0x360] ss:$16 sps:$4 sm:$0xff]   ;;  %v5437_v3 = vld [vmem:[%s7341_s4 + $0x208] ss:$16 sps:$4 sm:$0xff]  }
  0x13   : > { %416 = vmatprep.mubr.bf16.mxu0 %v5956_v2  ;;  %1004 = vmatpush1.bf16.msra.mxu0 %v5434_v5  ;;  %v5508_v29 = vld [vmem:[%s7341_s4 + $0x384] ss:$16 sps:$4 sm:$0xff]   ;;  %v5506_v30 = vld [vmem:[%s7341_s4 + $0x380] ss:$16 sps:$4 sm:$0xff]   ;;  %v5443_v5 = vld [vmem:[%s7341_s4 + $0x228] ss:$16 sps:$4 sm:$0xff]  }
  0x14   : > { %1005 = vmatprep.subr.bf16.mxu0 %v5442_v7  ;;  %v337_v34 = vld [vmem:[%s7339_s2] sm:$0x3]  ;;  %v5449_v7 = vld [vmem:[%s7341_s4 + $0x248] ss:$16 sps:$4 sm:$0xff]  }
  0x15   : > { %v342_v36 = vrot.slane %v337_v34, %v341_v33  ;;  %v346_v37 = vrot.slane %v337_v34, %v345_v35  ;;  %v5432_v63 = vld [vmem:[%s7340_s3] sm:$0x3f]  }
  0x16   : > { %v5518_v34 = vld [vmem:[%s7341_s4 + $0x3c0] ss:$16 sps:$4 sm:$0xff]  }
  0x17   : > { %1006 = vmatpush1.bf16.msra.mxu0 %v5440_v8  ;;  %v5457_v8 = vld [vmem:[%s7341_s4 + $0x26c] ss:$16 sps:$4 sm:$0xff]  }
  0x18   : > { %1007 = vmatprep.subr.bf16.mxu0 %v5448_v9  ;;  %v5455_v9 = vld [vmem:[%s7341_s4 + $0x268] ss:$16 sps:$4 sm:$0xff]  }
  0x1a   : > { %4408 = vmatmul.mubr.msk.bf16.gmra.mrb[4].mxu0 %vm367_vm0, %v5431_v4  ;;  %v5445_v4 = vld [vmem:[%s7341_s4 + $0x22c] ss:$16 sps:$4 sm:$0xff]  }
  0x1b   : > { %1008 = vmatpush1.bf16.msra.mxu0 %v5446_v10  ;;  %v5463_v10 = vld [vmem:[%s7341_s4 + $0x28c] ss:$16 sps:$4 sm:$0xff]  }
  0x1c   : > { %1009 = vmatprep.subr.bf16.mxu0 %v5454_v11  ;;  %v5461_v11 = vld [vmem:[%s7341_s4 + $0x288] ss:$16 sps:$4 sm:$0xff]  }
  0x1f   : > { %1010 = vmatpush1.bf16.msra.mxu0 %v5452_v12  ;;  %v5469_v12 = vld [vmem:[%s7341_s4 + $0x2ac] ss:$16 sps:$4 sm:$0xff]  }
  0x20   : > { %1011 = vmatprep.subr.bf16.mxu0 %v5460_v13  ;;  %v5467_v13 = vld [vmem:[%s7341_s4 + $0x2a8] ss:$16 sps:$4 sm:$0xff]  }
  0x23   : > { %1012 = vmatpush1.bf16.msra.mxu0 %v5458_v14  ;;  %v5475_v14 = vld [vmem:[%s7341_s4 + $0x2cc] ss:$16 sps:$4 sm:$0xff]  }
  0x24   : > { %1013 = vmatprep.subr.bf16.mxu0 %v5466_v15  ;;  %v5473_v15 = vld [vmem:[%s7341_s4 + $0x2c8] ss:$16 sps:$4 sm:$0xff]  }
  0x27   : > { %1014 = vmatpush1.bf16.msra.mxu0 %v5464_v16  ;;  %v5481_v16 = vld [vmem:[%s7341_s4 + $0x2ec] ss:$16 sps:$4 sm:$0xff]  }
  0x28   : > { %1015 = vmatprep.subr.bf16.mxu0 %v5472_v17  ;;  %v5479_v17 = vld [vmem:[%s7341_s4 + $0x2e8] ss:$16 sps:$4 sm:$0xff]  }
  0x2b   : > { %1016 = vmatpush1.bf16.msra.mxu0 %v5470_v18  ;;  %v5487_v18 = vld [vmem:[%s7341_s4 + $0x30c] ss:$16 sps:$4 sm:$0xff]  }
  0x2c   : > { %1017 = vmatprep.subr.bf16.mxu0 %v5478_v19  ;;  %v5485_v19 = vld [vmem:[%s7341_s4 + $0x308] ss:$16 sps:$4 sm:$0xff]  }
  0x2f   : > { %1018 = vmatpush1.bf16.msra.mxu0 %v5476_v20  ;;  %v5493_v20 = vld [vmem:[%s7341_s4 + $0x32c] ss:$16 sps:$4 sm:$0xff]  }
  0x30   : > { %1019 = vmatprep.subr.bf16.mxu0 %v5484_v21  ;;  %v5491_v21 = vld [vmem:[%s7341_s4 + $0x328] ss:$16 sps:$4 sm:$0xff]  }
  0x33   : > { %1020 = vmatpush1.bf16.msra.mxu0 %v5482_v22  ;;  %v5499_v22 = vld [vmem:[%s7341_s4 + $0x34c] ss:$16 sps:$4 sm:$0xff]  }
  0x34   : > { %1021 = vmatprep.subr.bf16.mxu0 %v5490_v23  ;;  %v5497_v23 = vld [vmem:[%s7341_s4 + $0x348] ss:$16 sps:$4 sm:$0xff]  }
  0x37   : > { %1022 = vmatpush1.bf16.msra.mxu0 %v5488_v24  ;;  %v5505_v24 = vld [vmem:[%s7341_s4 + $0x36c] ss:$16 sps:$4 sm:$0xff]  }
  0x38   : > { %1023 = vmatprep.subr.bf16.mxu0 %v5496_v25  ;;  %v5503_v25 = vld [vmem:[%s7341_s4 + $0x368] ss:$16 sps:$4 sm:$0xff]  }
  0x3b   : > { %1024 = vmatpush1.bf16.msra.mxu0 %v5494_v26  ;;  %v5511_v26 = vld [vmem:[%s7341_s4 + $0x38c] ss:$16 sps:$4 sm:$0xff]  }
  0x3c   : > { %1025 = vmatprep.subr.bf16.mxu0 %v5502_v27  ;;  %v5509_v27 = vld [vmem:[%s7341_s4 + $0x388] ss:$16 sps:$4 sm:$0xff]  }
  0x3f   : > { %1026 = vmatpush1.bf16.msra.mxu0 %v5500_v28  ;;  %v5514_v28 = vld [vmem:[%s7341_s4 + $0x3a4] ss:$16 sps:$4 sm:$0xff]  }
  0x40   : > { %1027 = vmatprep.subr.bf16.mxu0 %v5508_v29  ;;  %v5517_v29 = vld [vmem:[%s7341_s4 + $0x3ac] ss:$16 sps:$4 sm:$0xff]  }
  0x43   : > { %1028 = vmatpush1.bf16.msra.mxu0 %v5506_v30  ;;  %v5512_v30 = vld [vmem:[%s7341_s4 + $0x3a0] ss:$16 sps:$4 sm:$0xff]  }
  0x44   : > { %1029 = vmatprep.subr.bf16.mxu0 %v5514_v28  ;;  %v5580_v28 = vld [vmem:[%s7341_s4 + $0x104] ss:$16 sps:$4 sm:$0xff]  }
  0x47   : > { %1030 = vmatpush1.bf16.msra.mxu0 %v5512_v30  ;;  %v5578_v30 = vld [vmem:[%s7341_s4 + $0x100] ss:$16 sps:$4 sm:$0xff]  }
  0xe5   : > { %v408_v38 = vpop.f32.mrb[0].mxu0 }
  0xe6   : > { %v409_v39 = vadd.f32 %v408_v38, %v342_v36  ;;  %v410_v40 = vpop.f32.mrb[1].mxu0  ;;  %v5523_v38 = vld [vmem:[%s7341_s4 + $0x3cc] ss:$16 sps:$4 sm:$0xff]  }
  0xe7   : > { %v411_v41 = vadd.f32 %v410_v40, %v346_v37  ;;  %v412_v42 = vpop.f32.mrb[2].mxu0  ;;  %v5529_v40 = vld [vmem:[%s7341_s4 + $0x3ec] ss:$16 sps:$4 sm:$0xff]  }
  0xe8   : > { %v413_v43 = vadd.f32 %v412_v42, %v342_v36  ;;  %v414_v44 = vpop.f32.mrb[3].mxu0  ;;  %v425_v46 = vmax.f32 %v409_v39, 0.0  ;;  %v5526_v39 = vld [vmem:[%s7341_s4 + $0x3e4] ss:$16 sps:$4 sm:$0xff]   ;;  %v5527_v42 = vld [vmem:[%s7341_s4 + $0x3e8] ss:$16 sps:$4 sm:$0xff]  }
  0xe9   : > { %v415_v45 = vadd.f32 %v414_v44, %v346_v37  ;;  %v426_v48 = vmax.f32 %v411_v41, 0.0  ;;  %v5524_v41 = vld [vmem:[%s7341_s4 + $0x3e0] ss:$16 sps:$4 sm:$0xff]   ;;  %v5535_v44 = vld [vmem:[%s7341_s4 + $0xc] ss:$16 sps:$4 sm:$0xff]  }
  0xea   : > { %v427_v47 = vmax.f32 %v413_v43, 0.0  ;;  %v5532_v43 = vld [vmem:[%s7341_s4 + $0x4] ss:$16 sps:$4 sm:$0xff]  }
  0xeb   : > { %v428_v49 = vmax.f32 %v415_v45, 0.0 }
  0xec   : > { %v6119_v50 = vpack.c.bf16 %v427_v47, %v425_v46 }
  0xed   : > { %v6121_v51 = vpack.c.bf16 %v428_v49, %v426_v48  ;;  %v418_v52 = vpop.f32.mrb[4].mxu0 }
  0xee   : > { %v419_v53 = vadd.f32 %v418_v52, %v342_v36  ;;  %v420_v54 = vpop.f32.mrb[5].mxu0  ;;  %v5520_v36 = vld [vmem:[%s7341_s4 + $0x3c4] ss:$16 sps:$4 sm:$0xff]  }
  0xef   : > { %v421_v55 = vadd.f32 %v420_v54, %v346_v37  ;;  %v422_v56 = vpop.f32.mrb[6].mxu0  ;;  %453 = vmatprep.subr.bf16.mxu1 %v6121_v51  ;;  %v5521_v37 = vld [vmem:[%s7341_s4 + $0x3c8] ss:$16 sps:$4 sm:$0xff]   ;;  %1031 = vmatprep.subr.bf16.mxu0 %v5520_v36  ;;  %v5589_v36 = vld [vmem:[%s7341_s4 + $0x12c] ss:$16 sps:$4 sm:$0xff]  }
  0xf0   : > { %v429_v57 = vmax.f32 %v419_v53, 0.0  ;;  %v423_v58 = vpop.f32.mrb[7].mxu0  ;;  %454 = vmatpush1.bf16.msra.mxu1 %v6119_v50  ;;  %1032 = vmatpush1.bf16.msra.mxu0 %v5518_v34  ;;  %v5586_v34 = vld [vmem:[%s7341_s4 + $0x124] ss:$16 sps:$4 sm:$0xff]  }
  0xf1   : > { %v430_v59 = vmax.f32 %v421_v55, 0.0  ;;  %1033 = vmatprep.subr.bf16.mxu0 %v5526_v39  ;;  %v5592_v39 = vld [vmem:[%s7341_s4 + $0x144] ss:$16 sps:$4 sm:$0xff]  }
  0xf2   : > { %v433_v60 = vpack.c.bf16 %v429_v57, %v429_v57 }
  0xf3   : > { %v6125_v61 = vpack.c.bf16 %v430_v59, %v430_v59  ;;  %v5530_v59 = vld [vmem:[%s7341_s4] ss:$16 sps:$4 sm:$0xff]  }
  0xf4   : > { %v6128_v62 = vsel %vm446_vm1, %v433_v60, 0  ;;  %1034 = vmatpush1.bf16.msra.mxu0 %v5524_v41  ;;  %v5533_v60 = vld [vmem:[%s7341_s4 + $0x8] ss:$16 sps:$4 sm:$0xff]   ;;  %v5590_v41 = vld [vmem:[%s7341_s4 + $0x140] ss:$16 sps:$4 sm:$0xff]  }
  0xf5   : > { %4410 = vmatprep.subr.msk.bf16.mxu1 %vm446_vm1, %v6125_v61  ;;  %1409 = vmatprep.subr.bf16.mxu0 %v5532_v43  ;;  %v5598_v43 = vld [vmem:[%s7341_s4 + $0x164] ss:$16 sps:$4 sm:$0xff]  }
  0xf6   : > { %456 = vmatpush1.bf16.msra.mxu1 %v6128_v62 }
  0xf7   : > { %573 = vmatprep.subr.bf16.mxu1 %v6121_v51 }
  0xf9   : > { %4411 = vmatmul.mubr.msk.bf16.vlgmr.msra.gmra.mrb[0].mxu1 %vm442_vm2, %v5432_v63  ;;  %v5538_v63 = vld [vmem:[%s7341_s4 + $0x24] ss:$16 sps:$4 sm:$0xff]  }
  0xfa   : > { %574 = vmatpush1.bf16.msra.mxu1 %v6119_v50  ;;  %605 = vmatprep.mubr.bf16.mxu1 %v5956_v2 }
  0xfb   : > { %4415 = vmatprep.subr.msk.bf16.mxu1 %vm446_vm1, %v6125_v61 }
  0xfe   : > { %576 = vmatpush1.bf16.msra.mxu1 %v6128_v62 }
  0xff   : > { %1046 = vmatprep.subr.bf16.mxu1 %v5439_v0  ;;  %v5541_v0 = vld [vmem:[%s7341_s4 + $0x2c] ss:$16 sps:$4 sm:$0xff]  }
 0x101   : > { %4416 = vmatmul.mubr.msk.bf16.vlgmr.msra.gmra.mrb[4].mxu1 %vm442_vm2, %v5433_v1  ;;  %v5536_v1 = vld [vmem:[%s7341_s4 + $0x20] ss:$16 sps:$4 sm:$0xff]  }
 0x102   : > { %1047 = vmatpush1.bf16.msra.mxu1 %v5437_v3  ;;  %v5539_v3 = vld [vmem:[%s7341_s4 + $0x28] ss:$16 sps:$4 sm:$0xff]  }
 0x103   : > { %1048 = vmatprep.subr.bf16.mxu1 %v5445_v4  ;;  %v5544_v4 = vld [vmem:[%s7341_s4 + $0x44] ss:$16 sps:$4 sm:$0xff]  }
 0x106   : > { %1049 = vmatpush1.bf16.msra.mxu1 %v5443_v5  ;;  %v5547_v5 = vld [vmem:[%s7341_s4 + $0x4c] ss:$16 sps:$4 sm:$0xff]  }
 0x107   : > { %1050 = vmatprep.subr.bf16.mxu1 %v5451_v6  ;;  %v5542_v6 = vld [vmem:[%s7341_s4 + $0x40] ss:$16 sps:$4 sm:$0xff]  }
 0x10a   : > { %1051 = vmatpush1.bf16.msra.mxu1 %v5449_v7  ;;  %v5545_v7 = vld [vmem:[%s7341_s4 + $0x48] ss:$16 sps:$4 sm:$0xff]  }
 0x10b   : > { %1052 = vmatprep.subr.bf16.mxu1 %v5457_v8  ;;  %v5550_v8 = vld [vmem:[%s7341_s4 + $0x64] ss:$16 sps:$4 sm:$0xff]  }
 0x10e   : > { %1053 = vmatpush1.bf16.msra.mxu1 %v5455_v9  ;;  %v5553_v9 = vld [vmem:[%s7341_s4 + $0x6c] ss:$16 sps:$4 sm:$0xff]  }
 0x10f   : > { %1054 = vmatprep.subr.bf16.mxu1 %v5463_v10  ;;  %v5548_v10 = vld [vmem:[%s7341_s4 + $0x60] ss:$16 sps:$4 sm:$0xff]  }
 0x112   : > { %1055 = vmatpush1.bf16.msra.mxu1 %v5461_v11  ;;  %v5551_v11 = vld [vmem:[%s7341_s4 + $0x68] ss:$16 sps:$4 sm:$0xff]  }
 0x113   : > { %1056 = vmatprep.subr.bf16.mxu1 %v5469_v12  ;;  %v5556_v12 = vld [vmem:[%s7341_s4 + $0x84] ss:$16 sps:$4 sm:$0xff]  }
 0x116   : > { %1057 = vmatpush1.bf16.msra.mxu1 %v5467_v13  ;;  %v5559_v13 = vld [vmem:[%s7341_s4 + $0x8c] ss:$16 sps:$4 sm:$0xff]  }
 0x117   : > { %1058 = vmatprep.subr.bf16.mxu1 %v5475_v14  ;;  %v5554_v14 = vld [vmem:[%s7341_s4 + $0x80] ss:$16 sps:$4 sm:$0xff]  }
 0x11a   : > { %1059 = vmatpush1.bf16.msra.mxu1 %v5473_v15  ;;  %v5557_v15 = vld [vmem:[%s7341_s4 + $0x88] ss:$16 sps:$4 sm:$0xff]  }
 0x11b   : > { %1060 = vmatprep.subr.bf16.mxu1 %v5481_v16  ;;  %v5562_v16 = vld [vmem:[%s7341_s4 + $0xa4] ss:$16 sps:$4 sm:$0xff]  }
 0x11e   : > { %1061 = vmatpush1.bf16.msra.mxu1 %v5479_v17  ;;  %v5565_v17 = vld [vmem:[%s7341_s4 + $0xac] ss:$16 sps:$4 sm:$0xff]  }
 0x11f   : > { %1062 = vmatprep.subr.bf16.mxu1 %v5487_v18  ;;  %v5560_v18 = vld [vmem:[%s7341_s4 + $0xa0] ss:$16 sps:$4 sm:$0xff]  }
 0x122   : > { %1063 = vmatpush1.bf16.msra.mxu1 %v5485_v19  ;;  %v5563_v19 = vld [vmem:[%s7341_s4 + $0xa8] ss:$16 sps:$4 sm:$0xff]  }
 0x123   : > { %1064 = vmatprep.subr.bf16.mxu1 %v5493_v20  ;;  %v5568_v20 = vld [vmem:[%s7341_s4 + $0xc4] ss:$16 sps:$4 sm:$0xff]  }
 0x126   : > { %1065 = vmatpush1.bf16.msra.mxu1 %v5491_v21  ;;  %v5571_v21 = vld [vmem:[%s7341_s4 + $0xcc] ss:$16 sps:$4 sm:$0xff]  }
 0x127   : > { %1066 = vmatprep.subr.bf16.mxu1 %v5499_v22  ;;  %v5566_v22 = vld [vmem:[%s7341_s4 + $0xc0] ss:$16 sps:$4 sm:$0xff]  }
 0x12a   : > { %1067 = vmatpush1.bf16.msra.mxu1 %v5497_v23  ;;  %v5569_v23 = vld [vmem:[%s7341_s4 + $0xc8] ss:$16 sps:$4 sm:$0xff]  }
 0x12b   : > { %1068 = vmatprep.subr.bf16.mxu1 %v5505_v24  ;;  %v5574_v24 = vld [vmem:[%s7341_s4 + $0xe4] ss:$16 sps:$4 sm:$0xff]  }
 0x12e   : > { %1069 = vmatpush1.bf16.msra.mxu1 %v5503_v25  ;;  %v5577_v25 = vld [vmem:[%s7341_s4 + $0xec] ss:$16 sps:$4 sm:$0xff]  }
 0x12f   : > { %1070 = vmatprep.subr.bf16.mxu1 %v5511_v26  ;;  %v5572_v26 = vld [vmem:[%s7341_s4 + $0xe0] ss:$16 sps:$4 sm:$0xff]  }
 0x132   : > { %1071 = vmatpush1.bf16.msra.mxu1 %v5509_v27  ;;  %v5575_v27 = vld [vmem:[%s7341_s4 + $0xe8] ss:$16 sps:$4 sm:$0xff]  }
 0x133   : > { %1072 = vmatprep.subr.bf16.mxu1 %v5517_v29  ;;  %v5583_v29 = vld [vmem:[%s7341_s4 + $0x10c] ss:$16 sps:$4 sm:$0xff]  }
 0x136   : > { %1073 = vmatpush1.bf16.msra.mxu1 %v5515_v31  ;;  %v5581_v31 = vld [vmem:[%s7341_s4 + $0x108] ss:$16 sps:$4 sm:$0xff]  }
 0x137   : > { %1074 = vmatprep.subr.bf16.mxu1 %v5523_v38  ;;  %v5587_v38 = vld [vmem:[%s7341_s4 + $0x128] ss:$16 sps:$4 sm:$0xff]  }
 0x13a   : > { %1075 = vmatpush1.bf16.msra.mxu1 %v5521_v37  ;;  %v5584_v37 = vld [vmem:[%s7341_s4 + $0x120] ss:$16 sps:$4 sm:$0xff]  }
 0x13b   : > { %1076 = vmatprep.subr.bf16.mxu1 %v5529_v40  ;;  %v5595_v40 = vld [vmem:[%s7341_s4 + $0x14c] ss:$16 sps:$4 sm:$0xff]  }
 0x13e   : > { %1077 = vmatpush1.bf16.msra.mxu1 %v5527_v42  ;;  %v5593_v42 = vld [vmem:[%s7341_s4 + $0x148] ss:$16 sps:$4 sm:$0xff]  }
 0x13f   : > { %1452 = vmatprep.subr.bf16.mxu1 %v5535_v44  ;;  %v5601_v44 = vld [vmem:[%s7341_s4 + $0x16c] ss:$16 sps:$4 sm:$0xff]  }
 0x1cc   : > { %v487_v45 = vpop.f32.mrb[0].mxu1 }
 0x1cd   : > { %v489_v46 = vpop.f32.mrb[1].mxu1 }
 0x1ce   : > { %v491_v47 = vpop.f32.mrb[2].mxu1 }
 0x1cf   : > { %v6267_v48 = vpack.c.bf16 %v491_v47, %v487_v45  ;;  %v493_v49 = vpop.f32.mrb[3].mxu1  ;;  %v5596_v45 = vld [vmem:[%s7341_s4 + $0x160] ss:$16 sps:$4 sm:$0xff]   ;;  %v5604_v47 = vld [vmem:[%s7341_s4 + $0x184] ss:$16 sps:$4 sm:$0xff]  }
 0x1d0   : > { %v497_v52 = vpack.c.bf16 %v493_v49, %v489_v46  ;;  %v5599_v46 = vld [vmem:[%s7341_s4 + $0x168] ss:$16 sps:$4 sm:$0xff]   ;;  %v5607_v49 = vld [vmem:[%s7341_s4 + $0x18c] ss:$16 sps:$4 sm:$0xff]  }
 0x1d4   : > { %v607_v53 = vpop.f32.mrb[4].mxu1 }
 0x1d5   : > { %v609_v54 = vpop.f32.mrb[5].mxu1 }
 0x1d6   : > { %v611_v55 = vpop.f32.mrb[6].mxu1 }
 0x1d7   : > { %v616_v56 = vpack.c.bf16 %v611_v55, %v607_v53  ;;  %v613_v57 = vpop.f32.mrb[7].mxu1  ;;  %v5605_v53 = vld [vmem:[%s7341_s4 + $0x188] ss:$16 sps:$4 sm:$0xff]   ;;  %v5613_v55 = vld [vmem:[%s7341_s4 + $0x1ac] ss:$16 sps:$4 sm:$0xff]  }
 0x1d8   : > { %v617_v58 = vpack.c.bf16 %v613_v57, %v609_v54  ;;  %v5610_v54 = vld [vmem:[%s7341_s4 + $0x1a4] ss:$16 sps:$4 sm:$0xff]   ;;  %v5611_v57 = vld [vmem:[%s7341_s4 + $0x1a8] ss:$16 sps:$4 sm:$0xff]  }
 0x1da   : > { %1035 = vmatprep.mubr.bf16.mxu0 %v617_v58  ;;  %1078 = vmatprep.mubr.bf16.mxu1 %v617_v58  ;;  %v5616_v58 = vld [vmem:[%s7341_s4 + $0x1c4] ss:$16 sps:$4 sm:$0xff]  }
 0x1db   : > { %1036 = vmatmul.mubr.bf16.vlgmr.msra.gmra.mrb[8].mxu0 %v616_v56  ;;  %1079 = vmatmul.mubr.bf16.vlgmr.msra.gmra.mrb[8].mxu1 %v616_v56  ;;  %v5608_v56 = vld [vmem:[%s7341_s4 + $0x1a0] ss:$16 sps:$4 sm:$0xff]  }
 0x1dc   : > { %1410 = vmatpush1.bf16.msra.mxu0 %v5530_v59  ;;  %1453 = vmatpush1.bf16.msra.mxu1 %v5533_v60  ;;  %v5619_v59 = vld [vmem:[%s7341_s4 + $0x1cc] ss:$16 sps:$4 sm:$0xff]   ;;  %v5614_v60 = vld [vmem:[%s7341_s4 + $0x1c0] ss:$16 sps:$4 sm:$0xff]  }
 0x1dd   : > { %1441 = vmatprep.mubr.bf16.mxu0 %v497_v52  ;;  %1484 = vmatprep.mubr.bf16.mxu1 %v497_v52  ;;  %v5602_v52 = vld [vmem:[%s7341_s4 + $0x180] ss:$16 sps:$4 sm:$0xff]  }
 0x1de   : > { %1411 = vmatprep.subr.bf16.mxu0 %v5538_v63  ;;  %1454 = vmatprep.subr.bf16.mxu1 %v5541_v0  ;;  %v5617_v63 = vld [vmem:[%s7341_s4 + $0x1c8] ss:$16 sps:$4 sm:$0xff]   ;;  %v5622_v0 = vld [vmem:[%s7341_s4 + $0x1e4] ss:$16 sps:$4 sm:$0xff]  }
 0x1e0   : > { %1412 = vmatpush1.bf16.msra.mxu0 %v5536_v1  ;;  %1455 = vmatpush1.bf16.msra.mxu1 %v5539_v3  ;;  %v5625_v1 = vld [vmem:[%s7341_s4 + $0x1ec] ss:$16 sps:$4 sm:$0xff]   ;;  %v5620_v3 = vld [vmem:[%s7341_s4 + $0x1e0] ss:$16 sps:$4 sm:$0xff]  }
 0x1e1   : > { %1413 = vmatprep.subr.bf16.mxu0 %v5544_v4  ;;  %1456 = vmatprep.subr.bf16.mxu1 %v5547_v5  ;;  %v5623_v4 = vld [vmem:[%s7341_s4 + $0x1e8] ss:$16 sps:$4 sm:$0xff]   ;;  %v5677_v5 = vld [vmem:[%s7341_s4 + $0x40c] ss:$16 sps:$4 sm:$0xff]  }
 0x1e4   : > { %1414 = vmatpush1.bf16.msra.mxu0 %v5542_v6  ;;  %1457 = vmatpush1.bf16.msra.mxu1 %v5545_v7  ;;  %v5675_v6 = vld [vmem:[%s7341_s4 + $0x408] ss:$16 sps:$4 sm:$0xff]   ;;  %v5680_v7 = vld [vmem:[%s7341_s4 + $0x42c] ss:$16 sps:$4 sm:$0xff]  }
 0x1e5   : > { %1415 = vmatprep.subr.bf16.mxu0 %v5550_v8  ;;  %1458 = vmatprep.subr.bf16.mxu1 %v5553_v9  ;;  %v5629_v8 = vld [vmem:[%s7341_s4 + $0x404] ss:$16 sps:$4 sm:$0xff]   ;;  %v5678_v9 = vld [vmem:[%s7341_s4 + $0x428] ss:$16 sps:$4 sm:$0xff]  }
 0x1e8   : > { %1416 = vmatpush1.bf16.msra.mxu0 %v5548_v10  ;;  %1459 = vmatpush1.bf16.msra.mxu1 %v5551_v11  ;;  %v5626_v10 = vld [vmem:[%s7340_s3 + $0x10] sm:$0x3f]  }
 0x1e9   : > { %1417 = vmatprep.subr.bf16.mxu0 %v5556_v12  ;;  %1460 = vmatprep.subr.bf16.mxu1 %v5559_v13  ;;  %v5627_v11 = vld [vmem:[%s7341_s4 + $0x400] ss:$16 sps:$4 sm:$0xff]   ;;  %v5632_v12 = vld [vmem:[%s7341_s4 + $0x424] ss:$16 sps:$4 sm:$0xff]   ;;  %v5681_v13 = vld [vmem:[%s7341_s4 + $0x448] ss:$16 sps:$4 sm:$0xff]  }
 0x1ec   : > { %1418 = vmatpush1.bf16.msra.mxu0 %v5554_v14  ;;  %1461 = vmatpush1.bf16.msra.mxu1 %v5557_v15  ;;  %v5686_v14 = vld [vmem:[%s7341_s4 + $0x46c] ss:$16 sps:$4 sm:$0xff]   ;;  %v5630_v15 = vld [vmem:[%s7341_s4 + $0x420] ss:$16 sps:$4 sm:$0xff]  }
 0x1ed   : > { %1419 = vmatprep.subr.bf16.mxu0 %v5562_v16  ;;  %1462 = vmatprep.subr.bf16.mxu1 %v5565_v17  ;;  %v5635_v16 = vld [vmem:[%s7341_s4 + $0x444] ss:$16 sps:$4 sm:$0xff]   ;;  %v5684_v17 = vld [vmem:[%s7341_s4 + $0x468] ss:$16 sps:$4 sm:$0xff]  }
 0x1f0   : > { %1420 = vmatpush1.bf16.msra.mxu0 %v5560_v18  ;;  %1463 = vmatpush1.bf16.msra.mxu1 %v5563_v19  ;;  %v5689_v18 = vld [vmem:[%s7341_s4 + $0x48c] ss:$16 sps:$4 sm:$0xff]   ;;  %v5633_v19 = vld [vmem:[%s7341_s4 + $0x440] ss:$16 sps:$4 sm:$0xff]  }
 0x1f1   : > { %1421 = vmatprep.subr.bf16.mxu0 %v5568_v20  ;;  %1464 = vmatprep.subr.bf16.mxu1 %v5571_v21  ;;  %v5638_v20 = vld [vmem:[%s7341_s4 + $0x464] ss:$16 sps:$4 sm:$0xff]   ;;  %v5687_v21 = vld [vmem:[%s7341_s4 + $0x488] ss:$16 sps:$4 sm:$0xff]  }
 0x1f4   : > { %1422 = vmatpush1.bf16.msra.mxu0 %v5566_v22  ;;  %1465 = vmatpush1.bf16.msra.mxu1 %v5569_v23  ;;  %v5692_v22 = vld [vmem:[%s7341_s4 + $0x4ac] ss:$16 sps:$4 sm:$0xff]   ;;  %v5636_v23 = vld [vmem:[%s7341_s4 + $0x460] ss:$16 sps:$4 sm:$0xff]  }
 0x1f5   : > { %1423 = vmatprep.subr.bf16.mxu0 %v5574_v24  ;;  %1466 = vmatprep.subr.bf16.mxu1 %v5577_v25  ;;  %v5641_v24 = vld [vmem:[%s7341_s4 + $0x484] ss:$16 sps:$4 sm:$0xff]   ;;  %v5690_v25 = vld [vmem:[%s7341_s4 + $0x4a8] ss:$16 sps:$4 sm:$0xff]  }
 0x1f8   : > { %1424 = vmatpush1.bf16.msra.mxu0 %v5572_v26  ;;  %1467 = vmatpush1.bf16.msra.mxu1 %v5575_v27  ;;  %v5695_v26 = vld [vmem:[%s7341_s4 + $0x4cc] ss:$16 sps:$4 sm:$0xff]   ;;  %v5639_v27 = vld [vmem:[%s7341_s4 + $0x480] ss:$16 sps:$4 sm:$0xff]  }
 0x1f9   : > { %1425 = vmatprep.subr.bf16.mxu0 %v5580_v28  ;;  %1468 = vmatprep.subr.bf16.mxu1 %v5583_v29  ;;  %v5644_v28 = vld [vmem:[%s7341_s4 + $0x4a4] ss:$16 sps:$4 sm:$0xff]   ;;  %v5693_v29 = vld [vmem:[%s7341_s4 + $0x4c8] ss:$16 sps:$4 sm:$0xff]  }
 0x1fc   : > { %1426 = vmatpush1.bf16.msra.mxu0 %v5578_v30  ;;  %1469 = vmatpush1.bf16.msra.mxu1 %v5581_v31  ;;  %v5698_v30 = vld [vmem:[%s7341_s4 + $0x4ec] ss:$16 sps:$4 sm:$0xff]   ;;  %v5642_v31 = vld [vmem:[%s7341_s4 + $0x4a0] ss:$16 sps:$4 sm:$0xff]  }
 0x1fd   : > { %1427 = vmatprep.subr.bf16.mxu0 %v5586_v34  ;;  %1470 = vmatprep.subr.bf16.mxu1 %v5589_v36  ;;  %v5647_v34 = vld [vmem:[%s7341_s4 + $0x4c4] ss:$16 sps:$4 sm:$0xff]   ;;  %v5696_v36 = vld [vmem:[%s7341_s4 + $0x4e8] ss:$16 sps:$4 sm:$0xff]  }
 0x200   : > { %1428 = vmatpush1.bf16.msra.mxu0 %v5584_v37  ;;  %1471 = vmatpush1.bf16.msra.mxu1 %v5587_v38  ;;  %v5701_v37 = vld [vmem:[%s7341_s4 + $0x50c] ss:$16 sps:$4 sm:$0xff]   ;;  %v5645_v38 = vld [vmem:[%s7341_s4 + $0x4c0] ss:$16 sps:$4 sm:$0xff]  }
 0x201   : > { %1429 = vmatprep.subr.bf16.mxu0 %v5592_v39  ;;  %1472 = vmatprep.subr.bf16.mxu1 %v5595_v40  ;;  %v5650_v39 = vld [vmem:[%s7341_s4 + $0x4e4] ss:$16 sps:$4 sm:$0xff]   ;;  %v5699_v40 = vld [vmem:[%s7341_s4 + $0x508] ss:$16 sps:$4 sm:$0xff]  }
 0x204   : > { %1430 = vmatpush1.bf16.msra.mxu0 %v5590_v41  ;;  %1473 = vmatpush1.bf16.msra.mxu1 %v5593_v42  ;;  %v5704_v41 = vld [vmem:[%s7341_s4 + $0x52c] ss:$16 sps:$4 sm:$0xff]   ;;  %v5648_v42 = vld [vmem:[%s7341_s4 + $0x4e0] ss:$16 sps:$4 sm:$0xff]  }
 0x205   : > { %1431 = vmatprep.subr.bf16.mxu0 %v5598_v43  ;;  %1474 = vmatprep.subr.bf16.mxu1 %v5601_v44  ;;  %v5653_v43 = vld [vmem:[%s7341_s4 + $0x504] ss:$16 sps:$4 sm:$0xff]   ;;  %v5702_v44 = vld [vmem:[%s7341_s4 + $0x528] ss:$16 sps:$4 sm:$0xff]  }
 0x208   : > { %1432 = vmatpush1.bf16.msra.mxu0 %v5596_v45  ;;  %1475 = vmatpush1.bf16.msra.mxu1 %v5599_v46  ;;  %v5707_v45 = vld [vmem:[%s7341_s4 + $0x54c] ss:$16 sps:$4 sm:$0xff]   ;;  %v5651_v46 = vld [vmem:[%s7341_s4 + $0x500] ss:$16 sps:$4 sm:$0xff]  }
 0x209   : > { %1433 = vmatprep.subr.bf16.mxu0 %v5604_v47  ;;  %1476 = vmatprep.subr.bf16.mxu1 %v5607_v49  ;;  %v5656_v47 = vld [vmem:[%s7341_s4 + $0x524] ss:$16 sps:$4 sm:$0xff]   ;;  %v5705_v49 = vld [vmem:[%s7341_s4 + $0x548] ss:$16 sps:$4 sm:$0xff]  }
 0x20c   : > { %1434 = vmatpush1.bf16.msra.mxu0 %v5602_v52  ;;  %1477 = vmatpush1.bf16.msra.mxu1 %v5605_v53  ;;  %v5710_v52 = vld [vmem:[%s7341_s4 + $0x56c] ss:$16 sps:$4 sm:$0xff]   ;;  %v5654_v53 = vld [vmem:[%s7341_s4 + $0x520] ss:$16 sps:$4 sm:$0xff]  }
 0x20d   : > { %1435 = vmatprep.subr.bf16.mxu0 %v5610_v54  ;;  %1478 = vmatprep.subr.bf16.mxu1 %v5613_v55  ;;  %v5659_v54 = vld [vmem:[%s7341_s4 + $0x544] ss:$16 sps:$4 sm:$0xff]   ;;  %v5708_v55 = vld [vmem:[%s7341_s4 + $0x568] ss:$16 sps:$4 sm:$0xff]  }
 0x210   : > { %1436 = vmatpush1.bf16.msra.mxu0 %v5608_v56  ;;  %1479 = vmatpush1.bf16.msra.mxu1 %v5611_v57  ;;  %v5713_v56 = vld [vmem:[%s7341_s4 + $0x58c] ss:$16 sps:$4 sm:$0xff]   ;;  %v5657_v57 = vld [vmem:[%s7341_s4 + $0x540] ss:$16 sps:$4 sm:$0xff]  }
 0x211   : > { %1437 = vmatprep.subr.bf16.mxu0 %v5616_v58  ;;  %1480 = vmatprep.subr.bf16.mxu1 %v5619_v59  ;;  %v5662_v58 = vld [vmem:[%s7341_s4 + $0x564] ss:$16 sps:$4 sm:$0xff]   ;;  %v5711_v59 = vld [vmem:[%s7341_s4 + $0x588] ss:$16 sps:$4 sm:$0xff]  }
 0x214   : > { %1438 = vmatpush1.bf16.msra.mxu0 %v5614_v60  ;;  %1481 = vmatpush1.bf16.msra.mxu1 %v5617_v63  ;;  %v5716_v60 = vld [vmem:[%s7341_s4 + $0x5ac] ss:$16 sps:$4 sm:$0xff]   ;;  %v5660_v63 = vld [vmem:[%s7341_s4 + $0x560] ss:$16 sps:$4 sm:$0xff]  }
 0x215   : > { %1439 = vmatprep.subr.bf16.mxu0 %v5622_v0  ;;  %1482 = vmatprep.subr.bf16.mxu1 %v5625_v1  ;;  %v5665_v0 = vld [vmem:[%s7341_s4 + $0x584] ss:$16 sps:$4 sm:$0xff]   ;;  %v5714_v1 = vld [vmem:[%s7341_s4 + $0x5a8] ss:$16 sps:$4 sm:$0xff]  }
 0x218   : > { %1440 = vmatpush1.bf16.msra.mxu0 %v5620_v3  ;;  %1483 = vmatpush1.bf16.msra.mxu1 %v5623_v4  ;;  %v5719_v3 = vld [vmem:[%s7341_s4 + $0x5cc] ss:$16 sps:$4 sm:$0xff]   ;;  %v5663_v4 = vld [vmem:[%s7341_s4 + $0x580] ss:$16 sps:$4 sm:$0xff]  }
 0x219   : > { %1506 = vmatprep.subr.bf16.mxu0 %v6121_v51  ;;  %1979 = vmatprep.subr.bf16.mxu1 %v5677_v5  ;;  %v5668_v5 = vld [vmem:[%s7341_s4 + $0x5a4] ss:$16 sps:$4 sm:$0xff]  }
 0x21b   : > { %1442 = vmatmul.mubr.bf16.vlgmr.msra.gmra.mrb[8].mxu0 %v6267_v48  ;;  %1485 = vmatmul.mubr.bf16.vlgmr.msra.gmra.mrb[8].mxu1 %v6267_v48  ;;  %v5683_v48 = vld [vmem:[%s7341_s4 + $0x44c] ss:$16 sps:$4 sm:$0xff]  }
 0x21c   : > { %1507 = vmatpush1.bf16.msra.mxu0 %v6119_v50  ;;  %1538 = vmatprep.mubr.bf16.mxu0 %v5956_v2 }
 0x21d   : > { %4612 = vmatprep.subr.msk.bf16.mxu0 %vm446_vm1, %v6125_v61  ;;  %1980 = vmatpush1.bf16.msra.mxu1 %v5675_v6  ;;  %v5717_v6 = vld [vmem:[%s7341_s4 + $0x5c8] ss:$16 sps:$4 sm:$0xff]  }
 0x21e   : > { %1981 = vmatprep.subr.bf16.mxu1 %v5680_v7  ;;  %v5666_v7 = vld [vmem:[%s7341_s4 + $0x5a0] ss:$16 sps:$4 sm:$0xff]  }
 0x220   : > { %1509 = vmatpush1.bf16.msra.mxu0 %v6128_v62 }
 0x221   : > { %1936 = vmatprep.subr.bf16.mxu0 %v5629_v8  ;;  %1982 = vmatpush1.bf16.msra.mxu1 %v5678_v9  ;;  %v5671_v8 = vld [vmem:[%s7341_s4 + $0x5c4] ss:$16 sps:$4 sm:$0xff]   ;;  %v5669_v9 = vld [vmem:[%s7341_s4 + $0x5c0] ss:$16 sps:$4 sm:$0xff]  }
 0x222   : > { %1983 = vmatprep.subr.bf16.mxu1 %v5683_v48  ;;  %v5674_v48 = vld [vmem:[%s7341_s4 + $0x5e4] ss:$16 sps:$4 sm:$0xff]  }
 0x223   : > { %4613 = vmatmul.mubr.msk.bf16.vlgmr.msra.gmra.mrb[12].mxu0 %vm442_vm2, %v5626_v10  ;;  %v5672_v10 = vld [vmem:[%s7341_s4 + $0x5e0] ss:$16 sps:$4 sm:$0xff]  }
 0x224   : > { %1937 = vmatpush1.bf16.msra.mxu0 %v5627_v11  ;;  %v5722_v11 = vld [vmem:[%s7341_s4 + $0x5ec] ss:$16 sps:$4 sm:$0xff]  }
 0x225   : > { %1938 = vmatprep.subr.bf16.mxu0 %v5632_v12  ;;  %1984 = vmatpush1.bf16.msra.mxu1 %v5681_v13  ;;  %v5720_v12 = vld [vmem:[%s7341_s4 + $0x5e8] ss:$16 sps:$4 sm:$0xff]   ;;  %v5729_v13 = vld [vmem:[%s7341_s4 + $0x60c] ss:$16 sps:$4 sm:$0xff]  }
 0x226   : > { %1985 = vmatprep.subr.bf16.mxu1 %v5686_v14 }
 0x228   : > { %1939 = vmatpush1.bf16.msra.mxu0 %v5630_v15 }
 0x229   : > { %1940 = vmatprep.subr.bf16.mxu0 %v5635_v16  ;;  %1986 = vmatpush1.bf16.msra.mxu1 %v5684_v17 }
 0x22a   : > { %1987 = vmatprep.subr.bf16.mxu1 %v5689_v18 }
 0x22c   : > { %1941 = vmatpush1.bf16.msra.mxu0 %v5633_v19  ;;  %v5727_v19 = vld [vmem:[%s7341_s4 + $0x608] ss:$16 sps:$4 sm:$0xff]  }
 0x22d   : > { %1942 = vmatprep.subr.bf16.mxu0 %v5638_v20  ;;  %1988 = vmatpush1.bf16.msra.mxu1 %v5687_v21  ;;  %v5735_v20 = vld [vmem:[%s7341_s4 + $0x62c] ss:$16 sps:$4 sm:$0xff]   ;;  %v5726_v21 = vld [vmem:[%s7341_s4 + $0x604] ss:$16 sps:$4 sm:$0xff]  }
 0x22e   : > { %1989 = vmatprep.subr.bf16.mxu1 %v5692_v22  ;;  %v5733_v22 = vld [vmem:[%s7341_s4 + $0x628] ss:$16 sps:$4 sm:$0xff]  }
 0x230   : > { %1943 = vmatpush1.bf16.msra.mxu0 %v5636_v23  ;;  %v5741_v23 = vld [vmem:[%s7341_s4 + $0x64c] ss:$16 sps:$4 sm:$0xff]  }
 0x231   : > { %1944 = vmatprep.subr.bf16.mxu0 %v5641_v24  ;;  %1990 = vmatpush1.bf16.msra.mxu1 %v5690_v25  ;;  %v5732_v24 = vld [vmem:[%s7341_s4 + $0x624] ss:$16 sps:$4 sm:$0xff]   ;;  %v5739_v25 = vld [vmem:[%s7341_s4 + $0x648] ss:$16 sps:$4 sm:$0xff]  }
 0x232   : > { %1991 = vmatprep.subr.bf16.mxu1 %v5695_v26  ;;  %v5747_v26 = vld [vmem:[%s7341_s4 + $0x66c] ss:$16 sps:$4 sm:$0xff]  }
 0x234   : > { %1945 = vmatpush1.bf16.msra.mxu0 %v5639_v27  ;;  %v5738_v27 = vld [vmem:[%s7341_s4 + $0x644] ss:$16 sps:$4 sm:$0xff]  }
 0x235   : > { %1946 = vmatprep.subr.bf16.mxu0 %v5644_v28  ;;  %1992 = vmatpush1.bf16.msra.mxu1 %v5693_v29  ;;  %v5745_v28 = vld [vmem:[%s7341_s4 + $0x668] ss:$16 sps:$4 sm:$0xff]   ;;  %v5753_v29 = vld [vmem:[%s7341_s4 + $0x68c] ss:$16 sps:$4 sm:$0xff]  }
 0x236   : > { %1993 = vmatprep.subr.bf16.mxu1 %v5698_v30  ;;  %v5736_v30 = vld [vmem:[%s7341_s4 + $0x640] ss:$16 sps:$4 sm:$0xff]  }
 0x238   : > { %1947 = vmatpush1.bf16.msra.mxu0 %v5642_v31  ;;  %v5744_v31 = vld [vmem:[%s7341_s4 + $0x664] ss:$16 sps:$4 sm:$0xff]  }
 0x239   : > { %1948 = vmatprep.subr.bf16.mxu0 %v5647_v34  ;;  %1994 = vmatpush1.bf16.msra.mxu1 %v5696_v36  ;;  %v5751_v34 = vld [vmem:[%s7341_s4 + $0x688] ss:$16 sps:$4 sm:$0xff]   ;;  %v5759_v36 = vld [vmem:[%s7341_s4 + $0x6ac] ss:$16 sps:$4 sm:$0xff]  }
 0x23a   : > { %1995 = vmatprep.subr.bf16.mxu1 %v5701_v37  ;;  %v5742_v37 = vld [vmem:[%s7341_s4 + $0x660] ss:$16 sps:$4 sm:$0xff]  }
 0x23c   : > { %1949 = vmatpush1.bf16.msra.mxu0 %v5645_v38  ;;  %v5750_v38 = vld [vmem:[%s7341_s4 + $0x684] ss:$16 sps:$4 sm:$0xff]  }
 0x23d   : > { %1950 = vmatprep.subr.bf16.mxu0 %v5650_v39  ;;  %1996 = vmatpush1.bf16.msra.mxu1 %v5699_v40  ;;  %v5757_v39 = vld [vmem:[%s7341_s4 + $0x6a8] ss:$16 sps:$4 sm:$0xff]   ;;  %v5765_v40 = vld [vmem:[%s7341_s4 + $0x6cc] ss:$16 sps:$4 sm:$0xff]  }
 0x23e   : > { %1997 = vmatprep.subr.bf16.mxu1 %v5704_v41  ;;  %v5748_v41 = vld [vmem:[%s7341_s4 + $0x680] ss:$16 sps:$4 sm:$0xff]  }
 0x240   : > { %1951 = vmatpush1.bf16.msra.mxu0 %v5648_v42  ;;  %v5756_v42 = vld [vmem:[%s7341_s4 + $0x6a4] ss:$16 sps:$4 sm:$0xff]  }
 0x241   : > { %1952 = vmatprep.subr.bf16.mxu0 %v5653_v43  ;;  %1998 = vmatpush1.bf16.msra.mxu1 %v5702_v44  ;;  %v5763_v43 = vld [vmem:[%s7341_s4 + $0x6c8] ss:$16 sps:$4 sm:$0xff]   ;;  %v5771_v44 = vld [vmem:[%s7341_s4 + $0x6ec] ss:$16 sps:$4 sm:$0xff]  }
 0x242   : > { %1999 = vmatprep.subr.bf16.mxu1 %v5707_v45  ;;  %v5754_v45 = vld [vmem:[%s7341_s4 + $0x6a0] ss:$16 sps:$4 sm:$0xff]  }
 0x244   : > { %1953 = vmatpush1.bf16.msra.mxu0 %v5651_v46  ;;  %v5762_v46 = vld [vmem:[%s7341_s4 + $0x6c4] ss:$16 sps:$4 sm:$0xff]  }
 0x245   : > { %1954 = vmatprep.subr.bf16.mxu0 %v5656_v47  ;;  %2000 = vmatpush1.bf16.msra.mxu1 %v5705_v49  ;;  %v5769_v47 = vld [vmem:[%s7341_s4 + $0x6e8] ss:$16 sps:$4 sm:$0xff]   ;;  %v5777_v49 = vld [vmem:[%s7341_s4 + $0x70c] ss:$16 sps:$4 sm:$0xff]  }
 0x246   : > { %2001 = vmatprep.subr.bf16.mxu1 %v5710_v52  ;;  %v5760_v52 = vld [vmem:[%s7341_s4 + $0x6c0] ss:$16 sps:$4 sm:$0xff]  }
 0x248   : > { %1955 = vmatpush1.bf16.msra.mxu0 %v5654_v53  ;;  %v5768_v53 = vld [vmem:[%s7341_s4 + $0x6e4] ss:$16 sps:$4 sm:$0xff]  }
 0x249   : > { %1956 = vmatprep.subr.bf16.mxu0 %v5659_v54  ;;  %2002 = vmatpush1.bf16.msra.mxu1 %v5708_v55  ;;  %v5775_v54 = vld [vmem:[%s7341_s4 + $0x708] ss:$16 sps:$4 sm:$0xff]   ;;  %v5783_v55 = vld [vmem:[%s7341_s4 + $0x72c] ss:$16 sps:$4 sm:$0xff]  }
 0x24a   : > { %2003 = vmatprep.subr.bf16.mxu1 %v5713_v56  ;;  %v5766_v56 = vld [vmem:[%s7341_s4 + $0x6e0] ss:$16 sps:$4 sm:$0xff]  }
 0x24c   : > { %1957 = vmatpush1.bf16.msra.mxu0 %v5657_v57  ;;  %v5774_v57 = vld [vmem:[%s7341_s4 + $0x704] ss:$16 sps:$4 sm:$0xff]  }
 0x24d   : > { %1958 = vmatprep.subr.bf16.mxu0 %v5662_v58  ;;  %2004 = vmatpush1.bf16.msra.mxu1 %v5711_v59  ;;  %v5781_v58 = vld [vmem:[%s7341_s4 + $0x728] ss:$16 sps:$4 sm:$0xff]   ;;  %v5789_v59 = vld [vmem:[%s7341_s4 + $0x74c] ss:$16 sps:$4 sm:$0xff]  }
 0x24e   : > { %2005 = vmatprep.subr.bf16.mxu1 %v5716_v60  ;;  %v5772_v60 = vld [vmem:[%s7341_s4 + $0x700] ss:$16 sps:$4 sm:$0xff]  }
 0x250   : > { %1959 = vmatpush1.bf16.msra.mxu0 %v5660_v63  ;;  %v5780_v63 = vld [vmem:[%s7341_s4 + $0x724] ss:$16 sps:$4 sm:$0xff]  }
 0x251   : > { %1960 = vmatprep.subr.bf16.mxu0 %v5665_v0  ;;  %2006 = vmatpush1.bf16.msra.mxu1 %v5714_v1  ;;  %v5787_v0 = vld [vmem:[%s7341_s4 + $0x748] ss:$16 sps:$4 sm:$0xff]   ;;  %v5795_v1 = vld [vmem:[%s7341_s4 + $0x76c] ss:$16 sps:$4 sm:$0xff]  }
 0x252   : > { %2007 = vmatprep.subr.bf16.mxu1 %v5719_v3  ;;  %v5778_v3 = vld [vmem:[%s7341_s4 + $0x720] ss:$16 sps:$4 sm:$0xff]  }
 0x254   : > { %1961 = vmatpush1.bf16.msra.mxu0 %v5663_v4  ;;  %v5786_v4 = vld [vmem:[%s7341_s4 + $0x744] ss:$16 sps:$4 sm:$0xff]  }
 0x255   : > { %1962 = vmatprep.subr.bf16.mxu0 %v5668_v5  ;;  %2008 = vmatpush1.bf16.msra.mxu1 %v5717_v6  ;;  %v5793_v5 = vld [vmem:[%s7341_s4 + $0x768] ss:$16 sps:$4 sm:$0xff]   ;;  %v5801_v6 = vld [vmem:[%s7341_s4 + $0x78c] ss:$16 sps:$4 sm:$0xff]  }
 0x256   : > { %2009 = vmatprep.subr.bf16.mxu1 %v5722_v11  ;;  %v5798_v11 = vld [vmem:[%s7341_s4 + $0x784] ss:$16 sps:$4 sm:$0xff]  }
 0x258   : > { %1963 = vmatpush1.bf16.msra.mxu0 %v5666_v7  ;;  %v5784_v7 = vld [vmem:[%s7341_s4 + $0x740] ss:$16 sps:$4 sm:$0xff]  }
 0x259   : > { %1964 = vmatprep.subr.bf16.mxu0 %v5671_v8  ;;  %2010 = vmatpush1.bf16.msra.mxu1 %v5720_v12  ;;  %v5792_v8 = vld [vmem:[%s7341_s4 + $0x764] ss:$16 sps:$4 sm:$0xff]   ;;  %v5805_v12 = vld [vmem:[%s7341_s4 + $0x7a8] ss:$16 sps:$4 sm:$0xff]  }
 0x25a   : > { %2514 = vmatprep.subr.bf16.mxu1 %v5729_v13  ;;  %v5813_v13 = vld [vmem:[%s7341_s4 + $0x7cc] ss:$16 sps:$4 sm:$0xff]  }
 0x25c   : > { %1965 = vmatpush1.bf16.msra.mxu0 %v5669_v9  ;;  %v5799_v9 = vld [vmem:[%s7341_s4 + $0x788] ss:$16 sps:$4 sm:$0xff]  }
 0x25d   : > { %1966 = vmatprep.subr.bf16.mxu0 %v5674_v48  ;;  %v5807_v48 = vld [vmem:[%s7341_s4 + $0x7ac] ss:$16 sps:$4 sm:$0xff]  }
 0x260   : > { %1967 = vmatpush1.bf16.msra.mxu0 %v5672_v10  ;;  %v5790_v10 = vld [vmem:[%s7341_s4 + $0x760] ss:$16 sps:$4 sm:$0xff]  }
 0x261   : > { %2041 = vmatprep.subr.bf16.mxu0 %v6121_v51 }
 0x2f6   : > { %v1540_v14 = vpop.f32.mrb[12].mxu0 }
 0x2f7   : > { %v1542_v15 = vpop.f32.mrb[13].mxu0 }
 0x2f8   : > { %v1544_v16 = vpop.f32.mrb[14].mxu0 }
 0x2f9   : > { %v1549_v17 = vpack.c.bf16 %v1544_v16, %v1540_v14  ;;  %v1546_v51 = vpop.f32.mrb[15].mxu0  ;;  %v5796_v14 = vld [vmem:[%s7341_s4 + $0x780] ss:$16 sps:$4 sm:$0xff]   ;;  %v5811_v16 = vld [vmem:[%s7341_s4 + $0x7c8] ss:$16 sps:$4 sm:$0xff]  }
 0x2fa   : > { %v1550_v18 = vpack.c.bf16 %v1546_v51, %v1542_v15  ;;  %v5804_v15 = vld [vmem:[%s7341_s4 + $0x7a4] ss:$16 sps:$4 sm:$0xff]  }
 0x2fb   : > { %v5810_v51 = vld [vmem:[%s7341_s4 + $0x7c4] ss:$16 sps:$4 sm:$0xff]  }
 0x2fc   : > { %1968 = vmatprep.mubr.bf16.mxu0 %v1550_v18  ;;  %2011 = vmatprep.mubr.bf16.mxu1 %v1550_v18  ;;  %v5808_v18 = vld [vmem:[%s7341_s4 + $0x7c0] ss:$16 sps:$4 sm:$0xff]  }
 0x2fd   : > { %1969 = vmatmul.mubr.bf16.vlgmr.msra.gmra.mrb[8].mxu0 %v1549_v17  ;;  %2012 = vmatmul.mubr.bf16.vlgmr.msra.gmra.mrb[8].mxu1 %v1549_v17  ;;  %v5802_v17 = vld [vmem:[%s7341_s4 + $0x7a0] ss:$16 sps:$4 sm:$0xff]  }
 0x2fe   : > { %2042 = vmatpush1.bf16.msra.mxu0 %v6119_v50  ;;  %2073 = vmatprep.mubr.bf16.mxu0 %v5956_v2  ;;  %v5723_v50 = vld [vmem:[%s7340_s3 + $0x18] sm:$0x3f]  }
 0x2ff   : > { %4745 = vmatprep.subr.msk.bf16.mxu0 %vm446_vm1, %v6125_v61  ;;  %2515 = vmatpush1.bf16.msra.mxu1 %v5727_v19  ;;  %v5724_v61 = vld [vmem:[%s7341_s4 + $0x600] ss:$16 sps:$4 sm:$0xff]   ;;  %v5816_v19 = vld [vmem:[%s7341_s4 + $0x7e4] ss:$16 sps:$4 sm:$0xff]  }
 0x300   : > { %2516 = vmatprep.subr.bf16.mxu1 %v5735_v20  ;;  %v5819_v20 = vld [vmem:[%s7341_s4 + $0x7ec] ss:$16 sps:$4 sm:$0xff]  }
 0x302   : > { %2044 = vmatpush1.bf16.msra.mxu0 %v6128_v62  ;;  %v5730_v62 = vld [vmem:[%s7341_s4 + $0x620] ss:$16 sps:$4 sm:$0xff]  }
 0x303   : > { %2471 = vmatprep.subr.bf16.mxu0 %v5726_v21  ;;  %2517 = vmatpush1.bf16.msra.mxu1 %v5733_v22  ;;  %v5814_v21 = vld [vmem:[%s7341_s4 + $0x7e0] ss:$16 sps:$4 sm:$0xff]   ;;  %v5817_v22 = vld [vmem:[%s7341_s4 + $0x7e8] ss:$16 sps:$4 sm:$0xff]  }
 0x304   : > { %2518 = vmatprep.subr.bf16.mxu1 %v5741_v23 }
 0x305   : > { %4746 = vmatmul.mubr.msk.bf16.vlgmr.msra.gmra.mrb[16].mxu0 %vm442_vm2, %v5723_v50 }
 0x306   : > { %2472 = vmatpush1.bf16.msra.mxu0 %v5724_v61 }
 0x307   : > { %2473 = vmatprep.subr.bf16.mxu0 %v5732_v24  ;;  %2519 = vmatpush1.bf16.msra.mxu1 %v5739_v25 }
 0x308   : > { %2520 = vmatprep.subr.bf16.mxu1 %v5747_v26 }
 0x30a   : > { %2474 = vmatpush1.bf16.msra.mxu0 %v5730_v62  ;;  %v2577_v62 = vsub.s32 2, %v6108_v32 }
 0x30b   : > { %2475 = vmatprep.subr.bf16.mxu0 %v5738_v27  ;;  %2521 = vmatpush1.bf16.msra.mxu1 %v5745_v28  ;;  %v2565_v27 = vld [vmem:[%s7342_s5] sm:$0xf]  ;;  %v2581_v28 = vsub.s32 3, %v6108_v32 }
 0x30c   : > { %2522 = vmatprep.subr.bf16.mxu1 %v5753_v29  ;;  %v2570_v29 = vrot.slane %v2565_v27, %v341_v33 }
 0x30e   : > { %2476 = vmatpush1.bf16.msra.mxu0 %v5736_v30  ;;  %v2578_v30 = vrot.slane %v2565_v27, %v2577_v62  ;;  %v5844_v62 = vld [vmem:[%s7344_s7 + $0x170] sm:$0xff]  }
 0x30f   : > { %2477 = vmatprep.subr.bf16.mxu0 %v5744_v31  ;;  %2523 = vmatpush1.bf16.msra.mxu1 %v5751_v34  ;;  %v2574_v31 = vrot.slane %v2565_v27, %v345_v35  ;;  %v2582_v34 = vrot.slane %v2565_v27, %v2581_v28  ;;  %v5845_v27 = vld [vmem:[%s7344_s7 + $0x1f0] sm:$0xff]  }
 0x310   : > { %2524 = vmatprep.subr.bf16.mxu1 %v5759_v36  ;;  %v5846_v28 = vld [vmem:[%s7344_s7 + $0x130] sm:$0xff]  }
 0x312   : > { %2478 = vmatpush1.bf16.msra.mxu0 %v5742_v37 }
 0x313   : > { %2479 = vmatprep.subr.bf16.mxu0 %v5750_v38  ;;  %2525 = vmatpush1.bf16.msra.mxu1 %v5757_v39 }
 0x314   : > { %2526 = vmatprep.subr.bf16.mxu1 %v5765_v40 }
 0x316   : > { %2480 = vmatpush1.bf16.msra.mxu0 %v5748_v41 }
 0x317   : > { %2481 = vmatprep.subr.bf16.mxu0 %v5756_v42  ;;  %2527 = vmatpush1.bf16.msra.mxu1 %v5763_v43 }
 0x318   : > { %2528 = vmatprep.subr.bf16.mxu1 %v5771_v44 }
 0x31a   : > { %2482 = vmatpush1.bf16.msra.mxu0 %v5754_v45 }
 0x31b   : > { %2483 = vmatprep.subr.bf16.mxu0 %v5762_v46  ;;  %2529 = vmatpush1.bf16.msra.mxu1 %v5769_v47 }
 0x31c   : > { %2530 = vmatprep.subr.bf16.mxu1 %v5777_v49 }
 0x31e   : > { %2484 = vmatpush1.bf16.msra.mxu0 %v5760_v52 }
 0x31f   : > { %2485 = vmatprep.subr.bf16.mxu0 %v5768_v53  ;;  %2531 = vmatpush1.bf16.msra.mxu1 %v5775_v54 }
 0x320   : > { %2532 = vmatprep.subr.bf16.mxu1 %v5783_v55 }
 0x322   : > { %2486 = vmatpush1.bf16.msra.mxu0 %v5766_v56 }
 0x323   : > { %2487 = vmatprep.subr.bf16.mxu0 %v5774_v57  ;;  %2533 = vmatpush1.bf16.msra.mxu1 %v5781_v58 }
 0x324   : > { %2534 = vmatprep.subr.bf16.mxu1 %v5789_v59 }
 0x326   : > { %2488 = vmatpush1.bf16.msra.mxu0 %v5772_v60 }
 0x327   : > { %2489 = vmatprep.subr.bf16.mxu0 %v5780_v63  ;;  %2535 = vmatpush1.bf16.msra.mxu1 %v5787_v0 }
 0x328   : > { %2536 = vmatprep.subr.bf16.mxu1 %v5795_v1 }
 0x32a   : > { %2490 = vmatpush1.bf16.msra.mxu0 %v5778_v3 }
 0x32b   : > { %2491 = vmatprep.subr.bf16.mxu0 %v5786_v4  ;;  %2537 = vmatpush1.bf16.msra.mxu1 %v5793_v5  ;;  %v2607_v5 = vld [vmem:[%s7343_s6] sm:$0x7] }
 0x32c   : > { %2538 = vmatprep.subr.bf16.mxu1 %v5801_v6  ;;  %v5820_v6 = vld [vmem:[%s7344_s7 + $0x140] sm:$0xff]  }
 0x32e   : > { %2492 = vmatpush1.bf16.msra.mxu0 %v5784_v7  ;;  %v5821_v7 = vld [vmem:[%s7344_s7 + $0x1c0] sm:$0xff]  }
 0x32f   : > { %2493 = vmatprep.subr.bf16.mxu0 %v5792_v8  ;;  %2539 = vmatpush1.bf16.msra.mxu1 %v5799_v9  ;;  %v4879_v8 = vld [vmem:[%s7343_s6 + $0x4] sm:$0x7] }
 0x330   : > { %2540 = vmatprep.subr.bf16.mxu1 %v5807_v48  ;;  %v5822_v9 = vld [vmem:[%s7344_s7 + $0x100] sm:$0xff]  }
 0x331   : > { %v5823_v48 = vld [vmem:[%s7344_s7 + $0x180] sm:$0xff]  }
 0x332   : > { %2494 = vmatpush1.bf16.msra.mxu0 %v5790_v10  ;;  %v5824_v10 = vld [vmem:[%s7344_s7 + $0x148] sm:$0xff]  }
 0x333   : > { %2495 = vmatprep.subr.bf16.mxu0 %v5798_v11  ;;  %2541 = vmatpush1.bf16.msra.mxu1 %v5805_v12  ;;  %v5825_v11 = vld [vmem:[%s7344_s7 + $0x1c8] sm:$0xff]  }
 0x334   : > { %2542 = vmatprep.subr.bf16.mxu1 %v5813_v13  ;;  %v5826_v12 = vld [vmem:[%s7344_s7 + $0x108] sm:$0xff]  }
 0x335   : > { %v5827_v13 = vld [vmem:[%s7344_s7 + $0x188] sm:$0xff]  }
 0x336   : > { %2496 = vmatpush1.bf16.msra.mxu0 %v5796_v14  ;;  %v5828_v14 = vld [vmem:[%s7344_s7 + $0x150] sm:$0xff]  }
 0x337   : > { %2497 = vmatprep.subr.bf16.mxu0 %v5804_v15  ;;  %2543 = vmatpush1.bf16.msra.mxu1 %v5811_v16  ;;  %v5829_v15 = vld [vmem:[%s7344_s7 + $0x1d0] sm:$0xff]  }
 0x338   : > { %2544 = vmatprep.subr.bf16.mxu1 %v5819_v20  ;;  %v5830_v16 = vld [vmem:[%s7344_s7 + $0x110] sm:$0xff]   ;;  %v5835_v20 = vld [vmem:[%s7344_s7 + $0x198] sm:$0xff]  }
 0x33a   : > { %2498 = vmatpush1.bf16.msra.mxu0 %v5802_v17  ;;  %v5831_v17 = vld [vmem:[%s7344_s7 + $0x190] sm:$0xff]  }
 0x33b   : > { %2499 = vmatprep.subr.bf16.mxu0 %v5810_v51  ;;  %2545 = vmatpush1.bf16.msra.mxu1 %v5817_v22  ;;  %v5832_v51 = vld [vmem:[%s7344_s7 + $0x158] sm:$0xff]   ;;  %v5837_v22 = vld [vmem:[%s7344_s7 + $0x1e0] sm:$0xff]  }
 0x33e   : > { %2500 = vmatpush1.bf16.msra.mxu0 %v5808_v18  ;;  %v5833_v18 = vld [vmem:[%s7344_s7 + $0x1d8] sm:$0xff]  }
 0x33f   : > { %2501 = vmatprep.subr.bf16.mxu0 %v5816_v19  ;;  %v5834_v19 = vld [vmem:[%s7344_s7 + $0x118] sm:$0xff]  }
 0x342   : > { %2502 = vmatpush1.bf16.msra.mxu0 %v5814_v21  ;;  %v5836_v21 = vld [vmem:[%s7344_s7 + $0x160] sm:$0xff]  }
 0x3d8   : > { %v2075_v23 = vpop.f32.mrb[16].mxu0 }
 0x3d9   : > { %v2077_v50 = vpop.f32.mrb[17].mxu0 }
 0x3da   : > { %v2079_v61 = vpop.f32.mrb[18].mxu0 }
 0x3db   : > { %v2084_v24 = vpack.c.bf16 %v2079_v61, %v2075_v23  ;;  %v2081_v25 = vpop.f32.mrb[19].mxu0  ;;  %v5838_v23 = vld [vmem:[%s7344_s7 + $0x120] sm:$0xff]   ;;  %v5840_v61 = vld [vmem:[%s7344_s7 + $0x168] sm:$0xff]  }
 0x3dc   : > { %v2085_v26 = vpack.c.bf16 %v2081_v25, %v2077_v50  ;;  %v5839_v50 = vld [vmem:[%s7344_s7 + $0x1a0] sm:$0xff]   ;;  %v5842_v25 = vld [vmem:[%s7344_s7 + $0x128] sm:$0xff]  }
 0x3de   : > { %2503 = vmatprep.mubr.bf16.mxu0 %v2085_v26  ;;  %2546 = vmatprep.mubr.bf16.mxu1 %v2085_v26  ;;  %v5843_v26 = vld [vmem:[%s7344_s7 + $0x1a8] sm:$0xff]  }
 0x3df   : > { %2504 = vmatmul.mubr.bf16.vlgmr.msra.gmra.mrb[8].mxu0 %v2084_v24  ;;  %2547 = vmatmul.mubr.bf16.vlgmr.msra.gmra.mrb[8].mxu1 %v2084_v24  ;;  %v5841_v24 = vld [vmem:[%s7344_s7 + $0x1e8] sm:$0xff]  }
 0x3e0   : > { %2657 = vmatprep.mubr.bf16.mxu1 %v5956_v2  ;;  %2698 = vmatprep.mubr.bf16.mxu0 %v5956_v2 }
 0x4b2   : > { %v2505_v36 = vpop.f32.mrb[8].mxu0  ;;  %v2548_v37 = vpop.f32.mrb[8].mxu1 }
 0x4b3   : > { %v2587_v38 = vadd.f32 %v2570_v29, %v2505_v36  ;;  %v2589_v39 = vadd.f32 %v2578_v30, %v2548_v37  ;;  %v2507_v40 = vpop.f32.mrb[9].mxu0  ;;  %v2550_v41 = vpop.f32.mrb[9].mxu1  ;;  %v5851_v36 = vld [vmem:[%s7344_s7 + $0x1b8] sm:$0xff]   ;;  %v5852_v37 = vld [vmem:[%s7344_s7 + $0x40] sm:$0xff]  }
 0x4b4   : > { %v2588_v42 = vadd.f32 %v2574_v31, %v2507_v40  ;;  %v2590_v43 = vadd.f32 %v2582_v34, %v2550_v41  ;;  %v2509_v44 = vpop.f32.mrb[10].mxu0  ;;  %v2552_v45 = vpop.f32.mrb[10].mxu1 }
 0x4b5   : > { %v2591_v46 = vadd.f32 %v2570_v29, %v2509_v44  ;;  %v2593_v47 = vadd.f32 %v2578_v30, %v2552_v45  ;;  %v2511_v49 = vpop.f32.mrb[11].mxu0  ;;  %v2554_v52 = vpop.f32.mrb[11].mxu1  ;;  %v2595_v32 = vmax.f32 %v2587_v38, 0.0  ;;  %v2597_v35 = vmax.f32 %v2589_v39, 0.0  ;;  %v5847_v29 = vld [vmem:[%s7344_s7 + $0x1b0] sm:$0xff]   ;;  %v5848_v30 = vld [vmem:[%s7344_s7 + $0x178] sm:$0xff]  }
 0x4b6   : > { %v2592_v33 = vadd.f32 %v2574_v31, %v2511_v49  ;;  %v2594_v53 = vadd.f32 %v2582_v34, %v2554_v52  ;;  %v2596_v56 = vmax.f32 %v2588_v42, 0.0  ;;  %v2598_v57 = vmax.f32 %v2590_v43, 0.0  ;;  %v5849_v31 = vld [vmem:[%s7344_s7 + $0x1f8] sm:$0xff]   ;;  %v5853_v38 = vld [vmem:[%s7344_s7 + $0xc0] sm:$0xff]  }
 0x4b7   : > { %v2599_v54 = vmax.f32 %v2591_v46, 0.0  ;;  %v2601_v55 = vmax.f32 %v2593_v47, 0.0  ;;  %v5850_v34 = vld [vmem:[%s7344_s7 + $0x138] sm:$0xff]  }
 0x4b8   : > { %v2600_v58 = vmax.f32 %v2592_v33, 0.0  ;;  %v2602_v59 = vmax.f32 %v2594_v53, 0.0 }
 0x4b9   : > { %v2603_v60 = vpack.c.bf16 %v2599_v54, %v2595_v32  ;;  %v2605_v63 = vpack.c.bf16 %v2601_v55, %v2597_v35  ;;  %v5854_v55 = vld [vmem:[%s7344_s7] sm:$0xff]  }
 0x4ba   : > { %v6872_v0 = vpack.c.bf16 %v2600_v58, %v2596_v56  ;;  %v6874_v1 = vpack.c.bf16 %v2602_v59, %v2598_v57  ;;  %v5855_v56 = vld [vmem:[%s7344_s7 + $0x80] sm:$0xff]  }
 0x4bb   : > { %v6877_v3 = vsel %vm2612_vm3, %v2603_v60, 0  ;;  %v6880_v4 = vsel %vm2612_vm3, %v2605_v63, 0  ;;  %v5856_v63 = vld [vmem:[%s7344_s7 + $0x48] sm:$0xff]  }
 0x4bc   : > { %4875 = vmatprep.subr.msk.bf16.mxu1 %vm2612_vm3, %v6872_v0  ;;  %4877 = vmatprep.subr.msk.bf16.mxu0 %vm2612_vm3, %v6874_v1 }
 0x4bd   : > { %2626 = vmatpush1.bf16.msra.mxu1 %v6877_v3  ;;  %2667 = vmatpush1.bf16.msra.mxu0 %v6880_v4 }
 0x4be   : > { %4880 = vmatprep.subr.msk.bf16.mxu1 %vm2612_vm3, %v6872_v0  ;;  %4882 = vmatprep.subr.msk.bf16.mxu0 %vm2612_vm3, %v6874_v1 }
 0x4c0   : > { %4876 = vmatmul.mubr.msk.bf16.vlgmr.msra.gmra.mrb[12].mxu1 %vm2608_vm4, %v2607_v5  ;;  %4878 = vmatmul.mubr.msk.bf16.vlgmr.msra.gmra.mrb[20].mxu0 %vm2608_vm4, %v2607_v5  ;;  %v5857_v5 = vld [vmem:[%s7344_s7 + $0xc8] sm:$0xff]  }
 0x4c1   : > { %2781 = vmatpush1.bf16.msra.mxu1 %v6877_v3  ;;  %2822 = vmatpush1.bf16.msra.mxu0 %v6880_v4 }
 0x4c2   : > { %2812 = vmatprep.mubr.bf16.mxu1 %v5956_v2  ;;  %2853 = vmatprep.mubr.bf16.mxu0 %v5956_v2 }
 0x4c3   : > { %5217 = vmatprep.subr.bf16.mxu1 %v5820_v6  ;;  %5239 = vmatprep.subr.bf16.mxu0 %v5821_v7 }
 0x4c8   : > { %4881 = vmatmul.mubr.msk.bf16.vlgmr.msra.gmra.mrb[16].mxu1 %vm2608_vm4, %v4879_v8  ;;  %4883 = vmatmul.mubr.msk.bf16.vlgmr.msra.gmra.mrb[24].mxu0 %vm2608_vm4, %v4879_v8  ;;  %v5858_v8 = vld [vmem:[%s7344_s7 + $0x8] sm:$0xff]  }
 0x4c9   : > { %5218 = vmatpush3.bf16.msra.mxu1 %v5822_v9  ;;  %5240 = vmatpush3.bf16.msra.mxu0 %v5823_v48  ;;  %v5859_v9 = vld [vmem:[%s7344_s7 + $0x88] sm:$0xff]   ;;  %v5860_v48 = vld [vmem:[%s7344_s7 + $0x50] sm:$0xff]  }
 0x4ca   : > { %5219 = vmatprep.subr.bf16.mxu1 %v5824_v10  ;;  %5241 = vmatprep.subr.bf16.mxu0 %v5825_v11  ;;  %v5861_v10 = vld [vmem:[%s7344_s7 + $0xd0] sm:$0xff]  }
 0x4cb   : > { %v5862_v11 = vld [vmem:[%s7344_s7 + $0x10] sm:$0xff]  }
 0x4cd   : > { %5220 = vmatpush3.bf16.msra.mxu1 %v5826_v12  ;;  %5242 = vmatpush3.bf16.msra.mxu0 %v5827_v13  ;;  %v5863_v12 = vld [vmem:[%s7344_s7 + $0x90] sm:$0xff]   ;;  %v5864_v13 = vld [vmem:[%s7344_s7 + $0x58] sm:$0xff]  }
 0x4ce   : > { %5221 = vmatprep.subr.bf16.mxu1 %v5828_v14  ;;  %5243 = vmatprep.subr.bf16.mxu0 %v5829_v15  ;;  %v5865_v14 = vld [vmem:[%s7344_s7 + $0xd8] sm:$0xff]  }
 0x4cf   : > { %v5866_v15 = vld [vmem:[%s7344_s7 + $0x18] sm:$0xff]  }
 0x4d1   : > { %5222 = vmatpush3.bf16.msra.mxu1 %v5830_v16  ;;  %5244 = vmatpush3.bf16.msra.mxu0 %v5831_v17  ;;  %v5867_v16 = vld [vmem:[%s7344_s7 + $0x98] sm:$0xff]   ;;  %v5868_v17 = vld [vmem:[%s7344_s7 + $0x60] sm:$0xff]  }
 0x4d2   : > { %5223 = vmatprep.subr.bf16.mxu1 %v5832_v51  ;;  %5245 = vmatprep.subr.bf16.mxu0 %v5833_v18  ;;  %v5869_v51 = vld [vmem:[%s7344_s7 + $0xe0] sm:$0xff]  }
 0x4d3   : > { %v5870_v18 = vld [vmem:[%s7344_s7 + $0x20] sm:$0xff]  }
 0x4d5   : > { %5224 = vmatpush3.bf16.msra.mxu1 %v5834_v19  ;;  %5246 = vmatpush3.bf16.msra.mxu0 %v5835_v20  ;;  %v5871_v19 = vld [vmem:[%s7344_s7 + $0xa0] sm:$0xff]   ;;  %v5872_v20 = vld [vmem:[%s7344_s7 + $0x68] sm:$0xff]  }
 0x4d6   : > { %5225 = vmatprep.subr.bf16.mxu1 %v5836_v21  ;;  %5247 = vmatprep.subr.bf16.mxu0 %v5837_v22  ;;  %v5873_v21 = vld [vmem:[%s7344_s7 + $0xe8] sm:$0xff]  }
 0x4d7   : > { %v5874_v22 = vld [vmem:[%s7344_s7 + $0x28] sm:$0xff]  }
 0x4d9   : > { %5226 = vmatpush3.bf16.msra.mxu1 %v5838_v23  ;;  %5248 = vmatpush3.bf16.msra.mxu0 %v5839_v50  ;;  %v5875_v23 = vld [vmem:[%s7344_s7 + $0xa8] sm:$0xff]   ;;  %v5876_v50 = vld [vmem:[%s7344_s7 + $0x70] sm:$0xff]  }
 0x4da   : > { %5227 = vmatprep.subr.bf16.mxu1 %v5840_v61  ;;  %5249 = vmatprep.subr.bf16.mxu0 %v5841_v24  ;;  %v5877_v61 = vld [vmem:[%s7344_s7 + $0xf0] sm:$0xff]  }
 0x4db   : > { %v5878_v24 = vld [vmem:[%s7344_s7 + $0x30] sm:$0xff]  }
 0x4dd   : > { %5228 = vmatpush3.bf16.msra.mxu1 %v5842_v25  ;;  %5250 = vmatpush3.bf16.msra.mxu0 %v5843_v26  ;;  %v5879_v25 = vld [vmem:[%s7344_s7 + $0xb0] sm:$0xff]   ;;  %v5880_v26 = vld [vmem:[%s7344_s7 + $0x78] sm:$0xff]  }
 0x4de   : > { %5229 = vmatprep.subr.bf16.mxu1 %v5844_v62  ;;  %5251 = vmatprep.subr.bf16.mxu0 %v5845_v27  ;;  %v5881_v62 = vld [vmem:[%s7344_s7 + $0xf8] sm:$0xff]  }
 0x4df   : > { %v5882_v27 = vld [vmem:[%s7344_s7 + $0x38] sm:$0xff]  }
 0x4e1   : > { %5230 = vmatpush3.bf16.msra.mxu1 %v5846_v28  ;;  %5252 = vmatpush3.bf16.msra.mxu0 %v5847_v29  ;;  %v5883_v28 = vld [vmem:[%s7344_s7 + $0xb8] sm:$0xff]  }
 0x4e2   : > { %5231 = vmatprep.subr.bf16.mxu1 %v5848_v30  ;;  %5253 = vmatprep.subr.bf16.mxu0 %v5849_v31  ;;  %v5884_v31 = vld [vmem:[%s7344_s7 + $0x240] sm:$0xff]  }
 0x4e5   : > { %5232 = vmatpush3.bf16.msra.mxu1 %v5850_v34  ;;  %5254 = vmatpush3.bf16.msra.mxu0 %v5851_v36  ;;  %v5885_v34 = vld [vmem:[%s7344_s7 + $0x2c0] sm:$0xff]   ;;  %v5012_v36 = vld [vmem:[%s7343_s6 + $0x8] sm:$0x7] }
 0x4e6   : > { %5261 = vmatprep.subr.bf16.mxu1 %v5852_v37  ;;  %5283 = vmatprep.subr.bf16.mxu0 %v5853_v38  ;;  %v5886_v37 = vld [vmem:[%s7344_s7 + $0x200] sm:$0xff]  }
 0x4e7   : > { %v5887_v38 = vld [vmem:[%s7344_s7 + $0x280] sm:$0xff]  }
 0x593   : > { %v7008_v39 = vpop.f32.mrb[12].mxu1  ;;  %v7010_v40 = vpop.f32.mrb[20].mxu0 }
 0x594   : > { %v2661_v41 = vpop.f32.mrb[13].mxu1  ;;  %v2702_v42 = vpop.f32.mrb[21].mxu0  ;;  %v2707_v29 = vpack.c.bf16 %v7008_v39, %v7008_v39  ;;  %v2709_v30 = vpack.c.bf16 %v7010_v40, %v7010_v40  ;;  %v5888_v39 = vld [vmem:[%s7344_s7 + $0x248] sm:$0xff]  }
 0x595   : > { %v2663_v43 = vpop.f32.mrb[14].mxu1  ;;  %v2704_v44 = vpop.f32.mrb[22].mxu0  ;;  %v2708_v6 = vpack.c.bf16 %v2661_v41, %v2661_v41  ;;  %v2710_v7 = vpack.c.bf16 %v2702_v42, %v2702_v42  ;;  %v5889_v40 = vld [vmem:[%s7344_s7 + $0x2c8] sm:$0xff]  }
 0x596   : > { %v2664_v45 = vpop.f32.mrb[15].mxu1  ;;  %v2705_v46 = vpop.f32.mrb[23].mxu0  ;;  %v5890_v41 = vld [vmem:[%s7344_s7 + $0x208] sm:$0xff]   ;;  %v5892_v43 = vld [vmem:[%s7344_s7 + $0x250] sm:$0xff]  }
 0x597   : > { %v5891_v42 = vld [vmem:[%s7344_s7 + $0x288] sm:$0xff]   ;;  %v5893_v44 = vld [vmem:[%s7344_s7 + $0x2d0] sm:$0xff]  }
 0x598   : > { %v5894_v45 = vld [vmem:[%s7344_s7 + $0x210] sm:$0xff]  }
 0x599   : > { %v5895_v46 = vld [vmem:[%s7344_s7 + $0x290] sm:$0xff]  }
 0x59b   : > { %v2814_v47 = vpop.f32.mrb[16].mxu1  ;;  %v2855_v49 = vpop.f32.mrb[24].mxu0 }
 0x59c   : > { %v2816_v52 = vpop.f32.mrb[17].mxu1  ;;  %v2857_v33 = vpop.f32.mrb[25].mxu0  ;;  %v2862_v57 = vpack.c.bf16 %v2814_v47, %v2814_v47  ;;  %v2864_v58 = vpack.c.bf16 %v2855_v49, %v2855_v49  ;;  %v5896_v47 = vld [vmem:[%s7344_s7 + $0x258] sm:$0xff]  }
 0x59d   : > { %v2863_v53 = vpack.c.bf16 %v2816_v52, %v2816_v52  ;;  %v2865_v32 = vpack.c.bf16 %v2857_v33, %v2857_v33  ;;  %v2818_v35 = vpop.f32.mrb[18].mxu1  ;;  %v2859_v54 = vpop.f32.mrb[26].mxu0  ;;  %v5897_v49 = vld [vmem:[%s7344_s7 + $0x2d8] sm:$0xff]  }
 0x59e   : > { %v2819_v59 = vpop.f32.mrb[19].mxu1  ;;  %v2860_v60 = vpop.f32.mrb[27].mxu0  ;;  %v5898_v52 = vld [vmem:[%s7344_s7 + $0x218] sm:$0xff]   ;;  %v5902_v35 = vld [vmem:[%s7344_s7 + $0x220] sm:$0xff]  }
 0x59f   : > { %3155 = vmatprep.mubr.bf16.mxu1 %v2863_v53  ;;  %3195 = vmatprep.mubr.bf16.mxu0 %v2865_v32  ;;  %v5899_v33 = vld [vmem:[%s7344_s7 + $0x298] sm:$0xff]   ;;  %v5900_v53 = vld [vmem:[%s7344_s7 + $0x260] sm:$0xff]   ;;  %v5908_v59 = vld [vmem:[%s7344_s7 + $0x270] sm:$0xff]  }
 0x5a0   : > { %3156 = vmatmul.mubr.bf16.vlgmr.msra.gmra.mrb[20].mxu1 %v2862_v57  ;;  %3196 = vmatmul.mubr.bf16.vlgmr.msra.gmra.mrb[28].mxu0 %v2864_v58  ;;  %v5901_v32 = vld [vmem:[%s7344_s7 + $0x2e0] sm:$0xff]   ;;  %v5906_v57 = vld [vmem:[%s7344_s7 + $0x228] sm:$0xff]   ;;  %v5909_v60 = vld [vmem:[%s7344_s7 + $0x2f0] sm:$0xff]  }
 0x5a1   : > { %5262 = vmatpush3.bf16.msra.mxu1 %v5854_v55  ;;  %5284 = vmatpush3.bf16.msra.mxu0 %v5855_v56  ;;  %v5903_v54 = vld [vmem:[%s7344_s7 + $0x2a0] sm:$0xff]   ;;  %v5904_v55 = vld [vmem:[%s7344_s7 + $0x268] sm:$0xff]  }
 0x5a2   : > { %3427 = vmatprep.mubr.bf16.mxu1 %v2708_v6  ;;  %3467 = vmatprep.mubr.bf16.mxu0 %v2710_v7  ;;  %v5905_v56 = vld [vmem:[%s7344_s7 + $0x2e8] sm:$0xff]   ;;  %v5912_v6 = vld [vmem:[%s7344_s7 + $0x278] sm:$0xff]  }
 0x5a3   : > { %5263 = vmatprep.subr.bf16.mxu1 %v5856_v63  ;;  %5285 = vmatprep.subr.bf16.mxu0 %v5857_v5  ;;  %v5907_v58 = vld [vmem:[%s7344_s7 + $0x2a8] sm:$0xff]   ;;  %v5910_v63 = vld [vmem:[%s7344_s7 + $0x230] sm:$0xff]   ;;  %v5913_v7 = vld [vmem:[%s7344_s7 + $0x2f8] sm:$0xff]  }
 0x5a4   : > { %v5911_v5 = vld [vmem:[%s7344_s7 + $0x2b0] sm:$0xff]  }
 0x5a5   : > { %5264 = vmatpush3.bf16.msra.mxu1 %v5858_v8  ;;  %5286 = vmatpush3.bf16.msra.mxu0 %v5859_v9  ;;  %v5914_v8 = vld [vmem:[%s7344_s7 + $0x238] sm:$0xff]  }
 0x5a6   : > { %5265 = vmatprep.subr.bf16.mxu1 %v5860_v48  ;;  %5287 = vmatprep.subr.bf16.mxu0 %v5861_v10  ;;  %v5915_v9 = vld [vmem:[%s7344_s7 + $0x2b8] sm:$0xff]  }
 0x5a9   : > { %5266 = vmatpush3.bf16.msra.mxu1 %v5862_v11  ;;  %5288 = vmatpush3.bf16.msra.mxu0 %v5863_v12 }
 0x5aa   : > { %5267 = vmatprep.subr.bf16.mxu1 %v5864_v13  ;;  %5289 = vmatprep.subr.bf16.mxu0 %v5865_v14 }
 0x5ad   : > { %5268 = vmatpush3.bf16.msra.mxu1 %v5866_v15  ;;  %5290 = vmatpush3.bf16.msra.mxu0 %v5867_v16 }
 0x5ae   : > { %5269 = vmatprep.subr.bf16.mxu1 %v5868_v17  ;;  %5291 = vmatprep.subr.bf16.mxu0 %v5869_v51 }
 0x5b1   : > { %5270 = vmatpush3.bf16.msra.mxu1 %v5870_v18  ;;  %5292 = vmatpush3.bf16.msra.mxu0 %v5871_v19 }
 0x5b2   : > { %5271 = vmatprep.subr.bf16.mxu1 %v5872_v20  ;;  %5293 = vmatprep.subr.bf16.mxu0 %v5873_v21 }
 0x5b5   : > { %5272 = vmatpush3.bf16.msra.mxu1 %v5874_v22  ;;  %5294 = vmatpush3.bf16.msra.mxu0 %v5875_v23 }
 0x5b6   : > { %5273 = vmatprep.subr.bf16.mxu1 %v5876_v50  ;;  %5295 = vmatprep.subr.bf16.mxu0 %v5877_v61 }
 0x5b9   : > { %5274 = vmatpush3.bf16.msra.mxu1 %v5878_v24  ;;  %5296 = vmatpush3.bf16.msra.mxu0 %v5879_v25 }
 0x5ba   : > { %5275 = vmatprep.subr.bf16.mxu1 %v5880_v26  ;;  %5297 = vmatprep.subr.bf16.mxu0 %v5881_v62 }
 0x5bd   : > { %5276 = vmatpush3.bf16.msra.mxu1 %v5882_v27  ;;  %5298 = vmatpush3.bf16.msra.mxu0 %v5883_v28 }
 0x5be   : > { %5013 = vmatprep.subr.msk.bf16.mxu1 %vm2612_vm3, %v6872_v0  ;;  %5015 = vmatprep.subr.msk.bf16.mxu0 %vm2612_vm3, %v6874_v1 }
 0x5c0   : > { %3428 = vmatmul.mubr.bf16.vlgmr.msra.gmra.mrb[24].mxu1 %v2707_v29  ;;  %3468 = vmatmul.mubr.bf16.vlgmr.msra.gmra.mrb[32].mxu0 %v2709_v30 }
 0x5c1   : > { %3481 = vmatpush1.bf16.msra.mxu1 %v6877_v3  ;;  %3522 = vmatpush1.bf16.msra.mxu0 %v6880_v4 }
 0x5c2   : > { %3512 = vmatprep.mubr.bf16.mxu1 %v5956_v2  ;;  %3553 = vmatprep.mubr.bf16.mxu0 %v5956_v2 }
 0x5c3   : > { %5305 = vmatprep.subr.bf16.mxu1 %v5884_v31  ;;  %5327 = vmatprep.subr.bf16.mxu0 %v5885_v34 }
 0x5c8   : > { %5014 = vmatmul.mubr.msk.bf16.vlgmr.msra.gmra.mrb[28].mxu1 %vm2608_vm4, %v5012_v36  ;;  %5016 = vmatmul.mubr.msk.bf16.vlgmr.msra.gmra.mrb[36].mxu0 %vm2608_vm4, %v5012_v36 }
 0x5c9   : > { %5306 = vmatpush3.bf16.msra.mxu1 %v5886_v37  ;;  %5328 = vmatpush3.bf16.msra.mxu0 %v5887_v38 }
 0x5ca   : > { %5307 = vmatprep.subr.bf16.mxu1 %v5888_v39  ;;  %5329 = vmatprep.subr.bf16.mxu0 %v5889_v40 }
 0x5cd   : > { %5308 = vmatpush3.bf16.msra.mxu1 %v5890_v41  ;;  %5330 = vmatpush3.bf16.msra.mxu0 %v5891_v42  ;;  %v5916_v41 = vld [vmem:[%s7344_s7 + $0x340] sm:$0xff]  }
 0x5ce   : > { %5309 = vmatprep.subr.bf16.mxu1 %v5892_v43  ;;  %5331 = vmatprep.subr.bf16.mxu0 %v5893_v44  ;;  %v5917_v42 = vld [vmem:[%s7344_s7 + $0x3c0] sm:$0xff]   ;;  %v5113_v43 = vld [vmem:[%s7343_s6 + $0xc] sm:$0x7] }
 0x5cf   : > { %v5918_v44 = vld [vmem:[%s7344_s7 + $0x300] sm:$0xff]  }
 0x5d1   : > { %5310 = vmatpush3.bf16.msra.mxu1 %v5894_v45  ;;  %5332 = vmatpush3.bf16.msra.mxu0 %v5895_v46  ;;  %v5922_v45 = vld [vmem:[%s7344_s7 + $0x308] sm:$0xff]  }
 0x5d2   : > { %5311 = vmatprep.subr.bf16.mxu1 %v5896_v47  ;;  %5333 = vmatprep.subr.bf16.mxu0 %v5897_v49  ;;  %v5923_v46 = vld [vmem:[%s7344_s7 + $0x388] sm:$0xff]   ;;  %v5924_v47 = vld [vmem:[%s7344_s7 + $0x350] sm:$0xff]  }
 0x5d3   : > { %v5925_v49 = vld [vmem:[%s7344_s7 + $0x3d0] sm:$0xff]  }
 0x5d5   : > { %5312 = vmatpush3.bf16.msra.mxu1 %v5898_v52  ;;  %5334 = vmatpush3.bf16.msra.mxu0 %v5899_v33  ;;  %v5926_v52 = vld [vmem:[%s7344_s7 + $0x310] sm:$0xff]  }
 0x5d6   : > { %5313 = vmatprep.subr.bf16.mxu1 %v5900_v53  ;;  %5335 = vmatprep.subr.bf16.mxu0 %v5901_v32  ;;  %v5927_v33 = vld [vmem:[%s7344_s7 + $0x390] sm:$0xff]   ;;  %v5928_v53 = vld [vmem:[%s7344_s7 + $0x358] sm:$0xff]  }
 0x5d7   : > { %v5929_v32 = vld [vmem:[%s7344_s7 + $0x3d8] sm:$0xff]  }
 0x5d9   : > { %5314 = vmatpush3.bf16.msra.mxu1 %v5902_v35  ;;  %5336 = vmatpush3.bf16.msra.mxu0 %v5903_v54  ;;  %v5930_v35 = vld [vmem:[%s7344_s7 + $0x318] sm:$0xff]  }
 0x5da   : > { %5315 = vmatprep.subr.bf16.mxu1 %v5904_v55  ;;  %5337 = vmatprep.subr.bf16.mxu0 %v5905_v56  ;;  %v5931_v54 = vld [vmem:[%s7344_s7 + $0x398] sm:$0xff]   ;;  %v5932_v55 = vld [vmem:[%s7344_s7 + $0x360] sm:$0xff]  }
 0x5db   : > { %v5933_v56 = vld [vmem:[%s7344_s7 + $0x3e0] sm:$0xff]  }
 0x5dd   : > { %5316 = vmatpush3.bf16.msra.mxu1 %v5906_v57  ;;  %5338 = vmatpush3.bf16.msra.mxu0 %v5907_v58  ;;  %v5934_v57 = vld [vmem:[%s7344_s7 + $0x320] sm:$0xff]  }
 0x5de   : > { %5317 = vmatprep.subr.bf16.mxu1 %v5908_v59  ;;  %5339 = vmatprep.subr.bf16.mxu0 %v5909_v60  ;;  %v5935_v58 = vld [vmem:[%s7344_s7 + $0x3a0] sm:$0xff]   ;;  %v5936_v59 = vld [vmem:[%s7344_s7 + $0x368] sm:$0xff]  }
 0x5df   : > { %v5937_v60 = vld [vmem:[%s7344_s7 + $0x3e8] sm:$0xff]  }
 0x5e1   : > { %5318 = vmatpush3.bf16.msra.mxu1 %v5910_v63  ;;  %5340 = vmatpush3.bf16.msra.mxu0 %v5911_v5  ;;  %v5938_v63 = vld [vmem:[%s7344_s7 + $0x328] sm:$0xff]  }
 0x5e2   : > { %5319 = vmatprep.subr.bf16.mxu1 %v5912_v6  ;;  %5341 = vmatprep.subr.bf16.mxu0 %v5913_v7  ;;  %v5939_v5 = vld [vmem:[%s7344_s7 + $0x3a8] sm:$0xff]   ;;  %v5940_v6 = vld [vmem:[%s7344_s7 + $0x370] sm:$0xff]  }
 0x5e3   : > { %v5941_v7 = vld [vmem:[%s7344_s7 + $0x3f0] sm:$0xff]  }
 0x5e5   : > { %5320 = vmatpush3.bf16.msra.mxu1 %v5914_v8  ;;  %5342 = vmatpush3.bf16.msra.mxu0 %v5915_v9  ;;  %v5942_v8 = vld [vmem:[%s7344_s7 + $0x330] sm:$0xff]  }
 0x5e6   : > { %5114 = vmatprep.subr.msk.bf16.mxu1 %vm2612_vm3, %v6872_v0  ;;  %5116 = vmatprep.subr.msk.bf16.mxu0 %vm2612_vm3, %v6874_v1  ;;  %v5943_v9 = vld [vmem:[%s7344_s7 + $0x3b0] sm:$0xff]  }
 0x673   : > { %v5233_v48 = vpop.f32.mrb[20].mxu1  ;;  %v5255_v10 = vpop.f32.mrb[28].mxu0 }
 0x674   : > { %v5234_v11 = vpop.f32.mrb[21].mxu1  ;;  %v5256_v12 = vpop.f32.mrb[29].mxu0 }
 0x675   : > { %v5235_v13 = vadd.f32 %v5234_v11, %v5233_v48  ;;  %v5257_v14 = vadd.f32 %v5256_v12, %v5255_v10  ;;  %v5236_v15 = vpop.f32.mrb[22].mxu1  ;;  %v5258_v16 = vpop.f32.mrb[30].mxu0  ;;  %v5944_v48 = vld [vmem:[%s7344_s7 + $0x378] sm:$0xff]  }
 0x676   : > { %v5237_v17 = vpop.f32.mrb[23].mxu1  ;;  %v5259_v51 = vpop.f32.mrb[31].mxu0  ;;  %v5945_v10 = vld [vmem:[%s7344_s7 + $0x3f8] sm:$0xff]  }
 0x677   : > { %v3198_v18 = vadd.f32 %v5257_v14, %v5235_v13  ;;  %v5946_v11 = vld [vmem:[%s7344_s7 + $0x338] sm:$0xff]  }
 0x678   : > { %v5947_v12 = vld [vmem:[%s7344_s7 + $0x3b8] sm:$0xff]  }
 0x693   : > { %v5277_v19 = vpop.f32.mrb[24].mxu1  ;;  %v5299_v20 = vpop.f32.mrb[32].mxu0 }
 0x694   : > { %v5278_v21 = vpop.f32.mrb[25].mxu1  ;;  %v5300_v22 = vpop.f32.mrb[33].mxu0 }
 0x695   : > { %v5279_v23 = vadd.f32 %v5278_v21, %v5277_v19  ;;  %v5301_v0 = vadd.f32 %v5300_v22, %v5299_v20  ;;  %v5280_v50 = vpop.f32.mrb[26].mxu1  ;;  %v5302_v61 = vpop.f32.mrb[34].mxu0 }
 0x696   : > { %v5281_v1 = vpop.f32.mrb[27].mxu1  ;;  %v5303_v24 = vpop.f32.mrb[35].mxu0 }
 0x697   : > { %v3430_v25 = vadd.f32 %v5279_v23, %v3198_v18 }
 0x699   : > { %v7219_v26 = vadd.f32 %v5301_v0, %v3430_v25 }
 0x69b   : > { %v3514_v62 = vpop.f32.mrb[28].mxu1  ;;  %v3555_v27 = vpop.f32.mrb[36].mxu0 }
 0x69c   : > { %v3516_v28 = vpop.f32.mrb[29].mxu1  ;;  %v3557_v29 = vpop.f32.mrb[37].mxu0  ;;  %v3562_v37 = vpack.c.bf16 %v3514_v62, %v3514_v62  ;;  %v3564_v38 = vpack.c.bf16 %v3555_v27, %v3555_v27 }
 0x69d   : > { %v3563_v30 = vpack.c.bf16 %v3516_v28, %v3516_v28  ;;  %v3565_v31 = vpack.c.bf16 %v3557_v29, %v3557_v29  ;;  %v3518_v34 = vpop.f32.mrb[30].mxu1  ;;  %v3559_v36 = vpop.f32.mrb[38].mxu0 }
 0x69e   : > { %v3519_v39 = vpop.f32.mrb[31].mxu1  ;;  %v3560_v40 = vpop.f32.mrb[39].mxu0 }
 0x69f   : > { %3855 = vmatprep.mubr.bf16.mxu1 %v3563_v30  ;;  %3895 = vmatprep.mubr.bf16.mxu0 %v3565_v31 }
 0x6a0   : > { %3856 = vmatmul.mubr.bf16.vlgmr.msra.gmra.mrb[32].mxu1 %v3562_v37  ;;  %3896 = vmatmul.mubr.bf16.vlgmr.msra.gmra.mrb[40].mxu0 %v3564_v38 }
 0x6a1   : > { %3910 = vmatpush1.bf16.msra.mxu1 %v6877_v3  ;;  %3951 = vmatpush1.bf16.msra.mxu0 %v6880_v4  ;;  %v5919_v3 = vld [vmem:[%s7344_s7 + $0x380] sm:$0xff]   ;;  %v5920_v4 = vld [vmem:[%s7344_s7 + $0x348] sm:$0xff]  }
 0x6a2   : > { %3941 = vmatprep.mubr.bf16.mxu1 %v5956_v2  ;;  %3982 = vmatprep.mubr.bf16.mxu0 %v5956_v2  ;;  %v5921_v2 = vld [vmem:[%s7344_s7 + $0x3c8] sm:$0xff]  }
 0x6a3   : > { %5349 = vmatprep.subr.bf16.mxu1 %v5916_v41  ;;  %5371 = vmatprep.subr.bf16.mxu0 %v5917_v42 }
 0x6a8   : > { %5115 = vmatmul.mubr.msk.bf16.vlgmr.msra.gmra.mrb[36].mxu1 %vm2608_vm4, %v5113_v43  ;;  %5117 = vmatmul.mubr.msk.bf16.vlgmr.msra.gmra.mrb[44].mxu0 %vm2608_vm4, %v5113_v43 }
 0x6a9   : > { %5350 = vmatpush3.bf16.msra.mxu1 %v5918_v44  ;;  %5372 = vmatpush3.bf16.msra.mxu0 %v5919_v3  ;;  %v5214_v3 = vld [vmem:[%s7345_s8] ss:$0 sm:$0xff] }
 0x6aa   : > { %5351 = vmatprep.subr.bf16.mxu1 %v5920_v4  ;;  %5373 = vmatprep.subr.bf16.mxu0 %v5921_v2 }
 0x6ad   : > { %5352 = vmatpush3.bf16.msra.mxu1 %v5922_v45  ;;  %5374 = vmatpush3.bf16.msra.mxu0 %v5923_v46 }
 0x6ae   : > { %5353 = vmatprep.subr.bf16.mxu1 %v5924_v47  ;;  %5375 = vmatprep.subr.bf16.mxu0 %v5925_v49 }
 0x6b1   : > { %5354 = vmatpush3.bf16.msra.mxu1 %v5926_v52  ;;  %5376 = vmatpush3.bf16.msra.mxu0 %v5927_v33 }
 0x6b2   : > { %5355 = vmatprep.subr.bf16.mxu1 %v5928_v53  ;;  %5377 = vmatprep.subr.bf16.mxu0 %v5929_v32 }
 0x6b5   : > { %5356 = vmatpush3.bf16.msra.mxu1 %v5930_v35  ;;  %5378 = vmatpush3.bf16.msra.mxu0 %v5931_v54 }
 0x6b6   : > { %5357 = vmatprep.subr.bf16.mxu1 %v5932_v55  ;;  %5379 = vmatprep.subr.bf16.mxu0 %v5933_v56 }
 0x6b9   : > { %5358 = vmatpush3.bf16.msra.mxu1 %v5934_v57  ;;  %5380 = vmatpush3.bf16.msra.mxu0 %v5935_v58 }
 0x6ba   : > { %5359 = vmatprep.subr.bf16.mxu1 %v5936_v59  ;;  %5381 = vmatprep.subr.bf16.mxu0 %v5937_v60 }
 0x6bd   : > { %5360 = vmatpush3.bf16.msra.mxu1 %v5938_v63  ;;  %5382 = vmatpush3.bf16.msra.mxu0 %v5939_v5 }
 0x6be   : > { %5361 = vmatprep.subr.bf16.mxu1 %v5940_v6  ;;  %5383 = vmatprep.subr.bf16.mxu0 %v5941_v7 }
 0x6c1   : > { %5362 = vmatpush3.bf16.msra.mxu1 %v5942_v8  ;;  %5384 = vmatpush3.bf16.msra.mxu0 %v5943_v9 }
 0x6c2   : > { %5363 = vmatprep.subr.bf16.mxu1 %v5944_v48  ;;  %5385 = vmatprep.subr.bf16.mxu0 %v5945_v10 }
 0x6c5   : > { %5364 = vmatpush3.bf16.msra.mxu1 %v5946_v11  ;;  %5386 = vmatpush3.bf16.msra.mxu0 %v5947_v12 }
 0x773   : > { %v5321_v13 = vpop.f32.mrb[32].mxu1  ;;  %v5343_v14 = vpop.f32.mrb[40].mxu0 }
 0x774   : > { %v5322_v15 = vpop.f32.mrb[33].mxu1  ;;  %v5344_v16 = vpop.f32.mrb[41].mxu0 }
 0x775   : > { %v5323_v17 = vadd.f32 %v5322_v15, %v5321_v13  ;;  %v5345_v51 = vadd.f32 %v5344_v16, %v5343_v14  ;;  %v5324_v18 = vpop.f32.mrb[34].mxu1  ;;  %v5346_v19 = vpop.f32.mrb[42].mxu0 }
 0x776   : > { %v5325_v20 = vpop.f32.mrb[35].mxu1  ;;  %v5347_v21 = vpop.f32.mrb[43].mxu0 }
 0x777   : > { %v3898_v22 = vadd.f32 %v5345_v51, %v5323_v17 }
 0x779   : > { %v3903_v23 = vadd.f32 %v3898_v22, %v7219_v26 }
 0x77b   : > { %v3943_v0 = vpop.f32.mrb[36].mxu1  ;;  %v3984_v50 = vpop.f32.mrb[44].mxu0 }
 0x77c   : > { %v3945_v61 = vpop.f32.mrb[37].mxu1  ;;  %v3986_v1 = vpop.f32.mrb[45].mxu0  ;;  %v3991_v28 = vpack.c.bf16 %v3943_v0, %v3943_v0  ;;  %v3993_v29 = vpack.c.bf16 %v3984_v50, %v3984_v50 }
 0x77d   : > { %v3992_v24 = vpack.c.bf16 %v3945_v61, %v3945_v61  ;;  %v3994_v25 = vpack.c.bf16 %v3986_v1, %v3986_v1  ;;  %v3947_v62 = vpop.f32.mrb[38].mxu1  ;;  %v3988_v27 = vpop.f32.mrb[46].mxu0 }
 0x77e   : > { %v3948_v30 = vpop.f32.mrb[39].mxu1  ;;  %v3989_v31 = vpop.f32.mrb[47].mxu0 }
 0x77f   : > { %4284 = vmatprep.mubr.bf16.mxu1 %v3992_v24  ;;  %4324 = vmatprep.mubr.bf16.mxu0 %v3994_v25 }
 0x780   : > { %4285 = vmatmul.mubr.bf16.vlgmr.msra.gmra.mrb[40].mxu1 %v3991_v28  ;;  %4325 = vmatmul.mubr.bf16.vlgmr.msra.gmra.mrb[48].mxu0 %v3993_v29 }
 0x853   : > { %v5365_v34 = vpop.f32.mrb[40].mxu1  ;;  %v5387_v36 = vpop.f32.mrb[48].mxu0 }
 0x854   : > { %v5366_v26 = vpop.f32.mrb[41].mxu1  ;;  %v5388_v37 = vpop.f32.mrb[49].mxu0 }
 0x855   : > { %v5367_v38 = vadd.f32 %v5366_v26, %v5365_v34  ;;  %v5389_v39 = vadd.f32 %v5388_v37, %v5387_v36  ;;  %v5368_v40 = vpop.f32.mrb[42].mxu1  ;;  %v5390_v41 = vpop.f32.mrb[50].mxu0 }
 0x856   : > { %v5369_v42 = vpop.f32.mrb[43].mxu1  ;;  %v5391_v43 = vpop.f32.mrb[51].mxu0 }
 0x857   : > { %v4327_v44 = vadd.f32 %v5389_v39, %v5367_v38 }
 0x859   : > { %v4332_v4 = vadd.f32 %v4327_v44, %v3903_v23 }
 0x85b   : > { %v4340_v2 = vadd.f32 %v5214_v3, %v4332_v4 }
 0x85d   : > { %4342 = vst.msk [vmem:[%s330_s14] sm:$0x1f] %vm4341_vm5, %v4340_v2 }
 0x85e PF: > { %s19_s30 = sadd.s32 1, %s5954_s30  }
 0x85f   : > { %p16_p4 = scmp.ge.s32.totalorder %s19_s30, 4  }
 0x861   :  { %18 = sbr.rel (!%p16_p4) target bundleno = 1 (0x1), region = 98 }

</bundles_post_ra>
